<compile_context>
chip_gen: v7x
topology: tpu7x:2x2x1
jax: 0.10.0
libtpu: 0.0.40
codegen_flags: <defaults>
</compile_context>

<pallas_src>
import jax
import jax.numpy as jnp
from jax.experimental import pallas as pl
from jax.experimental.pallas import tpu as pltpu

N_DIM = 64
N_HEADS = 8
HEAD_DIM = N_DIM // N_HEADS


def _grid_steps_for_device(batch):
    """1 grid step on single-TensorCore chips (v5e/v6e); split the batch
    across the 2 TensorCores on v7x-class chips."""
    try:
        kind = jax.devices()[0].device_kind.lower()
    except Exception:
        kind = ""
    two_tensorcores = ("v7" in kind) or ("7x" in kind)
    if two_tensorcores and batch % 2 == 0:
        return 2
    return 1


def _make_mha_kernel(bb, S):
    D, H, hd = N_DIM, N_HEADS, HEAD_DIM

    def kernel(x_ref, wqk_ref, wvo_ref, bo_ref, out_ref, attnw_ref):
        # x_ref:     (bb*S, D)      all rows of this block, batch*seq flattened
        # wqk_ref:   (H, D, 2*hd)   per-head fused [Wq*scale | Wk]
        # wvo_ref:   (H, D, D)      per-head Wv_h @ Wo_h (value + out proj fused)
        # bo_ref:    (1, D)         out_proj bias
        # out_ref:   (bb, S, D)
        # attnw_ref: (bb, H, S, S)
        R = bb * S
        x = x_ref[...]                                          # (R, D)
        xh = jnp.broadcast_to(x, (H, R, D))                     # hoisted out of loops

        # Per-head Q/K projection for ALL rows of the block (one batched matmul,
        # scale already folded into the Q columns wrapper-side).
        qk = jnp.einsum('hrd,hde->hre', xh, wqk_ref[...],
                        preferred_element_type=jnp.float32)     # (H, R, 2*hd)
        # Fused value path: vo[h] = x @ (Wv_h @ Wo_h), already in output space.
        vo = jnp.einsum('hrd,hdf->hrf', xh, wvo_ref[...],
                        preferred_element_type=jnp.float32)     # (H, R, D)
        bo = bo_ref[...]                                        # (1, D)

        for b in range(bb):                                     # static, bb <= 2
            rows = slice(b * S, (b + 1) * S)                    # sublane-aligned
            q = qk[:, rows, :hd]                                # (H, S, hd)
            k = qk[:, rows, hd:]                                # (H, S, hd)
            scores = jnp.einsum('hse,hte->hst', q, k,
                                preferred_element_type=jnp.float32)   # (H, S, S)

            # Softmax over the HEAD axis (torch F.softmax default dim=1 on 4-D).
            m = jnp.max(scores, axis=0, keepdims=True)
            e = jnp.exp(scores - m)
            denom = jnp.sum(e, axis=0, keepdims=True)
            w = e * pl.reciprocal(denom, approx=False)          # (H, S, S)
            attnw_ref[b] = w.astype(attnw_ref.dtype)

            # attn_out @ Wo  ==  sum_h  w_h @ vo_h  (one contraction per head,
            # value projection and output projection already composed).
            out_h = jnp.einsum('hst,htd->hsd', w, vo[:, rows, :],
                               preferred_element_type=jnp.float32)    # (H, S, D)
            out_ref[b] = (jnp.sum(out_h, axis=0) + bo).astype(out_ref.dtype)

    return kernel


def mha_forward(x, wq_t, wk_t, wv_t, wo_t, bo, *, grid_steps=None):
    """Forward of the PyTorch MultiHeadAttention module.

    Returns (output (B,S,D), attention weights (B,H,S,S))."""
    B, S, D = x.shape
    assert D == N_DIM
    H, hd = N_HEADS, HEAD_DIM
    scale = hd ** (-0.5)

    if grid_steps is None:
        grid_steps = _grid_steps_for_device(B)
    assert B % grid_steps == 0
    bb = B // grid_steps

    # (D, D) transposed weight -> (H, D, hd): per-head output columns.
    def per_head_cols(w):
        return w.reshape(D, H, hd).transpose(1, 0, 2)

    # Fused per-head [Wq * scale | Wk]:  (H, D, 2*hd)
    wqk_h = jnp.concatenate(
        [per_head_cols(wq_t) * scale, per_head_cols(wk_t)], axis=-1)
    # Pre-compose value and output projections per head: (H, D, D)
    wv_h = per_head_cols(wv_t)                        # (H, D, hd)
    wo_h = wo_t.reshape(H, hd, D)                     # rows h*hd..(h+1)*hd of Wo^T
    wvo_h = jnp.einsum('hde,hef->hdf', wv_h, wo_h,
                       precision=jax.lax.Precision.HIGHEST)

    x_flat = x.reshape(B * S, D)

    out_shape = (
        jax.ShapeDtypeStruct((B, S, D), x.dtype),
        jax.ShapeDtypeStruct((B, H, S, S), jnp.float32),
    )
    grid_spec = pltpu.PrefetchScalarGridSpec(
        num_scalar_prefetch=0,
        grid=(grid_steps,),
        in_specs=[
            pl.BlockSpec((bb * S, D), lambda i: (i, 0)),           # x rows
            pl.BlockSpec((H, D, 2 * hd), lambda i: (0, 0, 0)),     # fused Q/K weights
            pl.BlockSpec((H, D, D), lambda i: (0, 0, 0)),          # fused V*O weights
            pl.BlockSpec((1, D), lambda i: (0, 0)),                # out_proj bias
        ],
        out_specs=[
            pl.BlockSpec((bb, S, D), lambda i: (i, 0, 0)),         # output
            pl.BlockSpec((bb, H, S, S), lambda i: (i, 0, 0, 0)),   # attn weights
        ],
        scratch_shapes=[],
    )
    return pl.pallas_call(
        _make_mha_kernel(bb, S),
        out_shape=out_shape,
        grid_spec=grid_spec,
        compiler_params=pltpu.CompilerParams(
            dimension_semantics=("parallel",)),
    )(x_flat, wqk_h, wvo_h, bo)


def ref_forward(x, wq_t, wk_t, wv_t, wo_t, bo):
    """Pure-JAX reference mirroring the PyTorch forward exactly."""
    B, S, D = x.shape
    hp = jax.lax.Precision.HIGHEST
    q = jnp.dot(x, wq_t, precision=hp).reshape(B, S, N_HEADS, HEAD_DIM).transpose(0, 2, 1, 3)
    k = jnp.dot(x, wk_t, precision=hp).reshape(B, S, N_HEADS, HEAD_DIM).transpose(0, 2, 1, 3)
    v = jnp.dot(x, wv_t, precision=hp).reshape(B, S, N_HEADS, HEAD_DIM).transpose(0, 2, 1, 3)
    scores = jnp.einsum('bhse,bhte->bhst', q, k, precision=hp) * HEAD_DIM ** (-0.5)
    w = jax.nn.softmax(scores, axis=1)   # torch default dim for 4-D = 1 (heads)
    attn = jnp.einsum('bhst,bhte->bhse', w, v, precision=hp)
    attn = attn.transpose(0, 2, 1, 3).reshape(B, S, D)
    out = jnp.dot(attn, wo_t, precision=hp) + bo
    return out, w


if __name__ == "__main__":
    key = jax.random.PRNGKey(0)
    kx, kq, kk, kv, ko, kb = jax.random.split(key, 6)

    B, S = 2, 8
    x = jax.random.normal(kx, (B, S, N_DIM), jnp.float32)

    # Deterministic synthetic parameters (already transposed to (in, out)).
    wq_t = 0.1 * jax.random.normal(kq, (N_DIM, N_DIM), jnp.float32)
    wk_t = 0.1 * jax.random.normal(kk, (N_DIM, N_DIM), jnp.float32)
    wv_t = 0.1 * jax.random.normal(kv, (N_DIM, N_DIM), jnp.float32)
    wo_t = 0.1 * jax.random.normal(ko, (N_DIM, N_DIM), jnp.float32)
    bo = 0.1 * jax.random.normal(kb, (1, N_DIM), jnp.float32)

    out, weights = jax.block_until_ready(
        mha_forward(x, wq_t, wk_t, wv_t, wo_t, bo))

    out_ref, w_ref = ref_forward(x, wq_t, wk_t, wv_t, wo_t, bo)

    assert out.shape == (B, S, N_DIM)
    assert weights.shape == (B, N_HEADS, S, S)
    assert jnp.allclose(out, out_ref, atol=1e-4, rtol=1e-4), \
        float(jnp.max(jnp.abs(out - out_ref)))
    assert jnp.allclose(weights, w_ref, atol=1e-5, rtol=1e-5), \
        float(jnp.max(jnp.abs(weights - w_ref)))

    print("KERNEL_OK")
</pallas_src>

<mosaic_0001>
module attributes {stable_mosaic.version = 11 : i64} {
  func.func @kernel(%arg0: i32, %arg1: memref<16x64xf32, #tpu.memory_space<vmem>>, %arg2: memref<8x64x16xf32, #tpu.memory_space<vmem>>, %arg3: memref<8x64x64xf32, #tpu.memory_space<vmem>>, %arg4: memref<1x64xf32, #tpu.memory_space<vmem>>, %arg5: memref<2x8x64xf32, #tpu.memory_space<vmem>>, %arg6: memref<2x8x8x8xf32, #tpu.memory_space<vmem>>) attributes {dimension_semantics = [#tpu.dimension_semantics<parallel>], iteration_bounds = array<i64: 1>, scalar_prefetch = 0 : i64, scratch_operands = 0 : i64, tpu.core_type = #tpu.core_type<tc>, window_params = [{transform_indices = @transform_0, window_bounds = array<i64: 16, 64>}, {pipeline_mode = #tpu.pipeline_mode<synchronous>, transform_indices = @transform_1, window_bounds = array<i64: 8, 64, 16>}, {pipeline_mode = #tpu.pipeline_mode<synchronous>, transform_indices = @transform_2, window_bounds = array<i64: 8, 64, 64>}, {pipeline_mode = #tpu.pipeline_mode<synchronous>, transform_indices = @transform_3, window_bounds = array<i64: 1, 64>}, {transform_indices = @transform_4, window_bounds = array<i64: 2, 8, 64>}, {transform_indices = @transform_5, window_bounds = array<i64: 2, 8, 8, 8>}]} {
    %c0 = arith.constant 0 : index
    %c0_0 = arith.constant 0 : index
    %0 = vector.load %arg1[%c0, %c0_0] : memref<16x64xf32, #tpu.memory_space<vmem>>, vector<16x64xf32>
    %1 = vector.shape_cast %0 : vector<16x64xf32> to vector<1x16x64xf32>
    %2 = vector.broadcast %1 : vector<1x16x64xf32> to vector<8x16x64xf32>
    %c0_1 = arith.constant 0 : index
    %c0_2 = arith.constant 0 : index
    %c0_3 = arith.constant 0 : index
    %3 = vector.load %arg2[%c0_1, %c0_2, %c0_3] : memref<8x64x16xf32, #tpu.memory_space<vmem>>, vector<8x64x16xf32>
    "tpu.trace_start"() <{level = 10 : i32, message = "hrd,hde->hre"}> : () -> ()
    %cst = arith.constant dense<0.000000e+00> : vector<8x16x16xf32>
    %4 = tpu.matmul %2, %3, %cst {dimension_numbers = #tpu.dot_dimension_numbers<[2], [1], [1], [2], [0, 0, 0, 1, 1, 2], [0], [0]>} : vector<8x16x64xf32>, vector<8x64x16xf32>, vector<8x16x16xf32> -> vector<8x16x16xf32>
    "tpu.trace_stop"() : () -> ()
    %c0_4 = arith.constant 0 : index
    %c0_5 = arith.constant 0 : index
    %c0_6 = arith.constant 0 : index
    %5 = vector.load %arg3[%c0_4, %c0_5, %c0_6] : memref<8x64x64xf32, #tpu.memory_space<vmem>>, vector<8x64x64xf32>
    "tpu.trace_start"() <{level = 10 : i32, message = "hrd,hdf->hrf"}> : () -> ()
    %cst_7 = arith.constant dense<0.000000e+00> : vector<8x16x64xf32>
    %6 = tpu.matmul %2, %5, %cst_7 {dimension_numbers = #tpu.dot_dimension_numbers<[2], [1], [1], [2], [0, 0, 0, 1, 1, 2], [0], [0]>} : vector<8x16x64xf32>, vector<8x64x64xf32>, vector<8x16x64xf32> -> vector<8x16x64xf32>
    "tpu.trace_stop"() : () -> ()
    %c0_8 = arith.constant 0 : index
    %c0_9 = arith.constant 0 : index
    %7 = vector.load %arg4[%c0_8, %c0_9] : memref<1x64xf32, #tpu.memory_space<vmem>>, vector<1x64xf32>
    %8 = vector.extract_strided_slice %4 {offsets = [0, 0, 0], sizes = [8, 8, 8], strides = [1, 1, 1]} : vector<8x16x16xf32> to vector<8x8x8xf32>
    %9 = vector.extract_strided_slice %4 {offsets = [0, 0, 8], sizes = [8, 8, 8], strides = [1, 1, 1]} : vector<8x16x16xf32> to vector<8x8x8xf32>
    "tpu.trace_start"() <{level = 10 : i32, message = "hse,hte->hst"}> : () -> ()
    %cst_10 = arith.constant dense<0.000000e+00> : vector<8x8x8xf32>
    %10 = tpu.matmul %8, %9, %cst_10 {dimension_numbers = #tpu.dot_dimension_numbers<[2], [2], [1], [1], [0, 0, 0, 1, 1, 1], [0], [0]>} : vector<8x8x8xf32>, vector<8x8x8xf32>, vector<8x8x8xf32> -> vector<8x8x8xf32>
    "tpu.trace_stop"() : () -> ()
    %cst_11 = arith.constant dense<0xFF800000> : vector<8x8xf32>
    %11 = vector.multi_reduction <maximumf>, %10, %cst_11 [0] : vector<8x8x8xf32> to vector<8x8xf32>
    %12 = vector.shape_cast %11 : vector<8x8xf32> to vector<1x8x8xf32>
    %13 = vector.broadcast %12 : vector<1x8x8xf32> to vector<8x8x8xf32>
    %14 = arith.subf %10, %13 : vector<8x8x8xf32>
    %15 = math.exp %14 : vector<8x8x8xf32>
    %cst_12 = arith.constant dense<0.000000e+00> : vector<8x8xf32>
    %16 = vector.multi_reduction <add>, %15, %cst_12 [0] : vector<8x8x8xf32> to vector<8x8xf32>
    %17 = vector.shape_cast %16 : vector<8x8xf32> to vector<1x8x8xf32>
    %18 = tpu.reciprocal %17 : vector<1x8x8xf32> -> vector<1x8x8xf32>
    %19 = vector.broadcast %18 : vector<1x8x8xf32> to vector<8x8x8xf32>
    %20 = arith.mulf %15, %19 : vector<8x8x8xf32>
    %c0_13 = arith.constant 0 : index
    %c0_14 = arith.constant 0 : index
    %c0_15 = arith.constant 0 : index
    %c0_16 = arith.constant 0 : index
    %21 = vector.load %arg6[%c0_13, %c0_14, %c0_15, %c0_16] : memref<2x8x8x8xf32, #tpu.memory_space<vmem>>, vector<1x8x8x8xf32>
    %22 = vector.shape_cast %21 : vector<1x8x8x8xf32> to vector<8x8x8xf32>
    %23 = vector.shape_cast %20 : vector<8x8x8xf32> to vector<1x8x8x8xf32>
    tpu.vector_store %arg6[%c0_13, %c0_14, %c0_15, %c0_16], %23 {strides = array<i32>} : memref<2x8x8x8xf32, #tpu.memory_space<vmem>>, vector<1x8x8x8xf32>,
    %24 = vector.extract_strided_slice %6 {offsets = [0, 0, 0], sizes = [8, 8, 64], strides = [1, 1, 1]} : vector<8x16x64xf32> to vector<8x8x64xf32>
    "tpu.trace_start"() <{level = 10 : i32, message = "hst,htd->hsd"}> : () -> ()
    %cst_17 = arith.constant dense<0.000000e+00> : vector<8x8x64xf32>
    %25 = tpu.matmul %20, %24, %cst_17 {dimension_numbers = #tpu.dot_dimension_numbers<[2], [1], [1], [2], [0, 0, 0, 1, 1, 2], [0], [0]>} : vector<8x8x8xf32>, vector<8x8x64xf32>, vector<8x8x64xf32> -> vector<8x8x64xf32>
    "tpu.trace_stop"() : () -> ()
    %cst_18 = arith.constant dense<0.000000e+00> : vector<8x64xf32>
    %26 = vector.multi_reduction <add>, %25, %cst_18 [0] : vector<8x8x64xf32> to vector<8x64xf32>
    %27 = vector.broadcast %7 : vector<1x64xf32> to vector<8x64xf32>
    %28 = arith.addf %26, %27 : vector<8x64xf32>
    %c0_19 = arith.constant 0 : index
    %c0_20 = arith.constant 0 : index
    %c0_21 = arith.constant 0 : index
    %29 = vector.load %arg5[%c0_19, %c0_20, %c0_21] : memref<2x8x64xf32, #tpu.memory_space<vmem>>, vector<1x8x64xf32>
    %30 = vector.shape_cast %29 : vector<1x8x64xf32> to vector<8x64xf32>
    %31 = vector.shape_cast %28 : vector<8x64xf32> to vector<1x8x64xf32>
    tpu.vector_store %arg5[%c0_19, %c0_20, %c0_21], %31 {strides = array<i32>} : memref<2x8x64xf32, #tpu.memory_space<vmem>>, vector<1x8x64xf32>,
    %32 = vector.extract_strided_slice %4 {offsets = [0, 8, 0], sizes = [8, 8, 8], strides = [1, 1, 1]} : vector<8x16x16xf32> to vector<8x8x8xf32>
    %33 = vector.extract_strided_slice %4 {offsets = [0, 8, 8], sizes = [8, 8, 8], strides = [1, 1, 1]} : vector<8x16x16xf32> to vector<8x8x8xf32>
    "tpu.trace_start"() <{level = 10 : i32, message = "hse,hte->hst"}> : () -> ()
    %cst_22 = arith.constant dense<0.000000e+00> : vector<8x8x8xf32>
    %34 = tpu.matmul %32, %33, %cst_22 {dimension_numbers = #tpu.dot_dimension_numbers<[2], [2], [1], [1], [0, 0, 0, 1, 1, 1], [0], [0]>} : vector<8x8x8xf32>, vector<8x8x8xf32>, vector<8x8x8xf32> -> vector<8x8x8xf32>
    "tpu.trace_stop"() : () -> ()
    %cst_23 = arith.constant dense<0xFF800000> : vector<8x8xf32>
    %35 = vector.multi_reduction <maximumf>, %34, %cst_23 [0] : vector<8x8x8xf32> to vector<8x8xf32>
    %36 = vector.shape_cast %35 : vector<8x8xf32> to vector<1x8x8xf32>
    %37 = vector.broadcast %36 : vector<1x8x8xf32> to vector<8x8x8xf32>
    %38 = arith.subf %34, %37 : vector<8x8x8xf32>
    %39 = math.exp %38 : vector<8x8x8xf32>
    %cst_24 = arith.constant dense<0.000000e+00> : vector<8x8xf32>
    %40 = vector.multi_reduction <add>, %39, %cst_24 [0] : vector<8x8x8xf32> to vector<8x8xf32>
    %41 = vector.shape_cast %40 : vector<8x8xf32> to vector<1x8x8xf32>
    %42 = tpu.reciprocal %41 : vector<1x8x8xf32> -> vector<1x8x8xf32>
    %43 = vector.broadcast %42 : vector<1x8x8xf32> to vector<8x8x8xf32>
    %44 = arith.mulf %39, %43 : vector<8x8x8xf32>
    %c1 = arith.constant 1 : index
    %c0_25 = arith.constant 0 : index
    %c0_26 = arith.constant 0 : index
    %c0_27 = arith.constant 0 : index
    %45 = vector.load %arg6[%c1, %c0_25, %c0_26, %c0_27] : memref<2x8x8x8xf32, #tpu.memory_space<vmem>>, vector<1x8x8x8xf32>
    %46 = vector.shape_cast %45 : vector<1x8x8x8xf32> to vector<8x8x8xf32>
    %47 = vector.shape_cast %44 : vector<8x8x8xf32> to vector<1x8x8x8xf32>
    tpu.vector_store %arg6[%c1, %c0_25, %c0_26, %c0_27], %47 {strides = array<i32>} : memref<2x8x8x8xf32, #tpu.memory_space<vmem>>, vector<1x8x8x8xf32>,
    %48 = vector.extract_strided_slice %6 {offsets = [0, 8, 0], sizes = [8, 8, 64], strides = [1, 1, 1]} : vector<8x16x64xf32> to vector<8x8x64xf32>
    "tpu.trace_start"() <{level = 10 : i32, message = "hst,htd->hsd"}> : () -> ()
    %cst_28 = arith.constant dense<0.000000e+00> : vector<8x8x64xf32>
    %49 = tpu.matmul %44, %48, %cst_28 {dimension_numbers = #tpu.dot_dimension_numbers<[2], [1], [1], [2], [0, 0, 0, 1, 1, 2], [0], [0]>} : vector<8x8x8xf32>, vector<8x8x64xf32>, vector<8x8x64xf32> -> vector<8x8x64xf32>
    "tpu.trace_stop"() : () -> ()
    %cst_29 = arith.constant dense<0.000000e+00> : vector<8x64xf32>
    %50 = vector.multi_reduction <add>, %49, %cst_29 [0] : vector<8x8x64xf32> to vector<8x64xf32>
    %51 = vector.broadcast %7 : vector<1x64xf32> to vector<8x64xf32>
    %52 = arith.addf %50, %51 : vector<8x64xf32>
    %c1_30 = arith.constant 1 : index
    %c0_31 = arith.constant 0 : index
    %c0_32 = arith.constant 0 : index
    %53 = vector.load %arg5[%c1_30, %c0_31, %c0_32] : memref<2x8x64xf32, #tpu.memory_space<vmem>>, vector<1x8x64xf32>
    %54 = vector.shape_cast %53 : vector<1x8x64xf32> to vector<8x64xf32>
    %55 = vector.shape_cast %52 : vector<8x64xf32> to vector<1x8x64xf32>
    tpu.vector_store %arg5[%c1_30, %c0_31, %c0_32], %55 {strides = array<i32>} : memref<2x8x64xf32, #tpu.memory_space<vmem>>, vector<1x8x64xf32>,
    return
  }
  func.func @transform_0(%arg0: i32) -> (i32, i32) {
    %c0_i32 = arith.constant 0 : i32
    %c0_i32_0 = arith.constant 0 : i32
    return %arg0, %c0_i32 : i32, i32
  }
  func.func @transform_1(%arg0: i32) -> (i32, i32, i32) {
    %c0_i32 = arith.constant 0 : i32
    %c0_i32_0 = arith.constant 0 : i32
    %c0_i32_1 = arith.constant 0 : i32
    %c0_i32_2 = arith.constant 0 : i32
    return %c0_i32, %c0_i32_0, %c0_i32_1 : i32, i32, i32
  }
  func.func @transform_2(%arg0: i32) -> (i32, i32, i32) {
    %c0_i32 = arith.constant 0 : i32
    %c0_i32_0 = arith.constant 0 : i32
    %c0_i32_1 = arith.constant 0 : i32
    %c0_i32_2 = arith.constant 0 : i32
    return %c0_i32, %c0_i32_0, %c0_i32_1 : i32, i32, i32
  }
  func.func @transform_3(%arg0: i32) -> (i32, i32) {
    %c0_i32 = arith.constant 0 : i32
    %c0_i32_0 = arith.constant 0 : i32
    %c0_i32_1 = arith.constant 0 : i32
    return %c0_i32, %c0_i32_0 : i32, i32
  }
  func.func @transform_4(%arg0: i32) -> (i32, i32, i32) {
    %c0_i32 = arith.constant 0 : i32
    %c0_i32_0 = arith.constant 0 : i32
    %c0_i32_1 = arith.constant 0 : i32
    return %arg0, %c0_i32, %c0_i32_0 : i32, i32, i32
  }
  func.func @transform_5(%arg0: i32) -> (i32, i32, i32, i32) {
    %c0_i32 = arith.constant 0 : i32
    %c0_i32_0 = arith.constant 0 : i32
    %c0_i32_1 = arith.constant 0 : i32
    %c0_i32_2 = arith.constant 0 : i32
    return %arg0, %c0_i32, %c0_i32_0, %c0_i32_1 : i32, i32, i32, i32
  }
}

</mosaic_0001>

<bundles_post_ra>
// kernel: tpu_custom_call.1
= control target key start
LH: loop header
LB: loop body
LE: loop exit
PB: predicated region body
PF: predicated region fallthrough
CT: control target
= control target key end

     0   :  { %11 = vsyncpa [#allocation3], 0  ;;  %vm87_vm0 = vcmask 523264   ;;  %s5908_s0 = inlined_call_operand.vmem [shape: f32[16,64], index: 0, kind: input, shape index: {}]   ;;  %s5909_s1 = inlined_call_operand.vmem [shape: f32[8,64,16], index: 1, kind: input, shape index: {}]   ;;  %s5910_s2 = inlined_call_operand.vmem [shape: f32[8,64,64], index: 2, kind: input, shape index: {}]   ;;  %s5911_s3 = inlined_call_operand.vmem [shape: f32[1,64], index: 3, kind: input, shape index: {}]   ;;  %s5912_s4 = inlined_call_operand.hbm [shape: f32[2,8,64], index: 4, kind: output, shape index: {0}]   ;;  %s5913_s5 = inlined_call_operand.hbm [shape: f32[2,8,8,8], index: 5, kind: output, shape index: {1}]  }
   0x1   :  { %v23_v0 = vld [vmem:[%s5909_s1] sm:$0xff]  ;;  %v24_v1 = vld [vmem:[%s5909_s1 + $0x8] sm:$0xff]  ;;  %v25_v5 = vld [vmem:[%s5909_s1 + $0x10] sm:$0xff] }
   0x2   :  { %v31_v2 = vld [vmem:[%s5909_s1 + $0x40] sm:$0xff]  ;;  %v4745_v3 = vpack.c.bf16 %v24_v1, %v23_v0  ;;  %v32_v4 = vld [vmem:[%s5909_s1 + $0x48] sm:$0xff]  ;;  %v26_v6 = vld [vmem:[%s5909_s1 + $0x18] sm:$0xff] }
   0x3   :  { %v4761_v7 = vpack.c.bf16 %v32_v4, %v31_v2  ;;  %v4749_v8 = vpack.c.bf16 %v26_v6, %v25_v5  ;;  %v33_v9 = vld [vmem:[%s5909_s1 + $0x50] sm:$0xff]  ;;  %v34_v10 = vld [vmem:[%s5909_s1 + $0x58] sm:$0xff]  ;;  %v27_v11 = vld [vmem:[%s5909_s1 + $0x20] sm:$0xff] }
   0x4   :  { %4746 = vmatprep.subr.bf16.mxu0 %v4745_v3  ;;  %v4765_v12 = vpack.c.bf16 %v34_v10, %v33_v9  ;;  %v28_v13 = vld [vmem:[%s5909_s1 + $0x28] sm:$0xff]  ;;  %v35_v14 = vld [vmem:[%s5909_s1 + $0x60] sm:$0xff]  ;;  %v29_v19 = vld [vmem:[%s5909_s1 + $0x30] sm:$0xff] }
   0x5   :  { %v36_v15 = vld [vmem:[%s5909_s1 + $0x68] sm:$0xff]  ;;  %4762 = vmatprep.subr.bf16.mxu1 %v4761_v7  ;;  %4748 = vmatpush3.bf16.msra.mxu0 %v4745_v3  ;;  %v4753_v16 = vpack.c.bf16 %v28_v13, %v27_v11  ;;  %v5168_v17 = vld [vmem:[%s5908_s0] sm:$0xff]  ;;  %v30_v20 = vld [vmem:[%s5909_s1 + $0x38] sm:$0xff] }
   0x6   :  { %4764 = vmatpush3.bf16.msra.mxu1 %v4761_v7  ;;  %4750 = vmatprep.subr.bf16.mxu0 %v4749_v8  ;;  %v4769_v18 = vpack.c.bf16 %v36_v15, %v35_v14  ;;  %v37_v21 = vld [vmem:[%s5909_s1 + $0x70] sm:$0xff]  ;;  %v38_v22 = vld [vmem:[%s5909_s1 + $0x78] sm:$0xff]  ;;  %v4757_v23 = vpack.c.bf16 %v30_v20, %v29_v19  ;;  %v39_v25 = vld [vmem:[%s5909_s1 + $0x80] sm:$0xff] }
   0x7   :  { %4766 = vmatprep.subr.bf16.mxu1 %v4765_v12  ;;  %4297 = vmatprep.mubr.msk.f32.mxu0 %vm87_vm0, %v5168_v17  ;;  %v4773_v24 = vpack.c.bf16 %v38_v22, %v37_v21  ;;  %v40_v26 = vld [vmem:[%s5909_s1 + $0x88] sm:$0xff]  ;;  %v47_v27 = vld [vmem:[%s5909_s1 + $0xc0] sm:$0xff]  ;;  %v41_v31 = vld [vmem:[%s5909_s1 + $0x90] sm:$0xff] }
   0x8   :  { %4316 = vmatprep.mubr.msk.f32.mxu1 %vm87_vm0, %v5168_v17  ;;  %v48_v28 = vld [vmem:[%s5909_s1 + $0xc8] sm:$0xff]  ;;  %v4777_v29 = vpack.c.bf16 %v40_v26, %v39_v25  ;;  %v42_v32 = vld [vmem:[%s5909_s1 + $0x98] sm:$0xff]  ;;  %v49_v33 = vld [vmem:[%s5909_s1 + $0xd0] sm:$0xff] }
   0x9   :  { %4752 = vmatpush3.bf16.msra.mxu0 %v4749_v8  ;;  %v4793_v30 = vpack.c.bf16 %v48_v28, %v47_v27  ;;  %v50_v34 = vld [vmem:[%s5909_s1 + $0xd8] sm:$0xff]  ;;  %v5213_v35 = vld [vmem:[%s5908_s0 + $0x8] sm:$0xff]  ;;  %v4781_v36 = vpack.c.bf16 %v42_v32, %v41_v31  ;;  %v43_v38 = vld [vmem:[%s5909_s1 + $0xa0] sm:$0xff] }
   0xa   :  { %4768 = vmatpush3.bf16.msra.mxu1 %v4765_v12  ;;  %4754 = vmatprep.subr.bf16.mxu0 %v4753_v16  ;;  %v4797_v37 = vpack.c.bf16 %v50_v34, %v49_v33  ;;  %v44_v39 = vld [vmem:[%s5909_s1 + $0xa8] sm:$0xff]  ;;  %v51_v40 = vld [vmem:[%s5909_s1 + $0xe0] sm:$0xff]  ;;  %v45_v44 = vld [vmem:[%s5909_s1 + $0xb0] sm:$0xff] }
   0xb   :  { %4770 = vmatprep.subr.bf16.mxu1 %v4769_v18  ;;  %v52_v41 = vld [vmem:[%s5909_s1 + $0xe8] sm:$0xff]  ;;  %v4785_v42 = vpack.c.bf16 %v44_v39, %v43_v38  ;;  %v46_v45 = vld [vmem:[%s5909_s1 + $0xb8] sm:$0xff] }
   0xc   :  { %v4801_v43 = vpack.c.bf16 %v52_v41, %v51_v40 }
   0xd   :  { %4756 = vmatpush3.bf16.msra.mxu0 %v4753_v16 }
   0xe   :  { %4772 = vmatpush3.bf16.msra.mxu1 %v4769_v18  ;;  %4758 = vmatprep.subr.bf16.mxu0 %v4757_v23 }
   0xf   :  { %4774 = vmatprep.subr.bf16.mxu1 %v4773_v24 }
  0x11   :  { %4760 = vmatpush3.bf16.msra.mxu0 %v4757_v23 }
  0x12   :  { %4776 = vmatpush3.bf16.msra.mxu1 %v4773_v24  ;;  %4778 = vmatprep.subr.bf16.mxu0 %v4777_v29 }
  0x13   :  { %4794 = vmatprep.subr.bf16.mxu1 %v4793_v30 }
  0x14   :  { %4298 = vmatmul.mubr.msk.f32.vlgmr.msra.gmra.mrb[0].mxu0 %vm87_vm0, %v5213_v35 }
  0x15   :  { %4317 = vmatmul.mubr.msk.f32.vlgmr.msra.gmra.mrb[0].mxu1 %vm87_vm0, %v5213_v35  ;;  %4780 = vmatpush3.bf16.msra.mxu0 %v4777_v29 }
  0x16   :  { %4796 = vmatpush3.bf16.msra.mxu1 %v4793_v30  ;;  %4782 = vmatprep.subr.bf16.mxu0 %v4781_v36 }
  0x17   :  { %4798 = vmatprep.subr.bf16.mxu1 %v4797_v37  ;;  %4335 = vmatprep.mubr.msk.f32.mxu0 %vm87_vm0, %v5168_v17 }
  0x18   :  { %12 = vsyncpa [#allocation5], 0  ;;  %v53_v46 = vld [vmem:[%s5909_s1 + $0xf0] sm:$0xff]  ;;  %v54_v47 = vld [vmem:[%s5909_s1 + $0xf8] sm:$0xff]  ;;  %4354 = vmatprep.mubr.msk.f32.mxu1 %vm87_vm0, %v5168_v17  ;;  %v4789_v48 = vpack.c.bf16 %v46_v45, %v45_v44  ;;  %vm5093_vm1 = vmmov 0   ;;  %vm1362_vm2 = vcmask 64512  }
  0x19   :  { %4784 = vmatpush3.bf16.msra.mxu0 %v4781_v36  ;;  %v4805_v49 = vpack.c.bf16 %v54_v47, %v53_v46  ;;  %v55_v50 = vld [vmem:[%s5909_s1 + $0x100] sm:$0xff]  ;;  %v56_v51 = vld [vmem:[%s5909_s1 + $0x108] sm:$0xff]  ;;  %v57_v56 = vld [vmem:[%s5909_s1 + $0x110] sm:$0xff] }
  0x1a   :  { %4800 = vmatpush3.bf16.msra.mxu1 %v4797_v37  ;;  %4786 = vmatprep.subr.bf16.mxu0 %v4785_v42  ;;  %v63_v52 = vld [vmem:[%s5909_s1 + $0x140] sm:$0xff]  ;;  %v64_v53 = vld [vmem:[%s5909_s1 + $0x148] sm:$0xff]  ;;  %v4809_v54 = vpack.c.bf16 %v56_v51, %v55_v50  ;;  %v58_v57 = vld [vmem:[%s5909_s1 + $0x118] sm:$0xff] }
  0x1b   :  { %4802 = vmatprep.subr.bf16.mxu1 %v4801_v43  ;;  %v4825_v55 = vpack.c.bf16 %v64_v53, %v63_v52  ;;  %v65_v58 = vld [vmem:[%s5909_s1 + $0x150] sm:$0xff]  ;;  %v66_v59 = vld [vmem:[%s5909_s1 + $0x158] sm:$0xff]  ;;  %v4813_v60 = vpack.c.bf16 %v58_v57, %v57_v56  ;;  %v59_v62 = vld [vmem:[%s5909_s1 + $0x120] sm:$0xff] }
  0x1c   :  { %v4829_v61 = vpack.c.bf16 %v66_v59, %v65_v58  ;;  %v60_v63 = vld [vmem:[%s5909_s1 + $0x128] sm:$0xff]  ;;  %v67_v0 = vld [vmem:[%s5909_s1 + $0x160] sm:$0xff]  ;;  %v61_v4 = vld [vmem:[%s5909_s1 + $0x130] sm:$0xff] }
  0x1d   :  { %4788 = vmatpush3.bf16.msra.mxu0 %v4785_v42  ;;  %v68_v1 = vld [vmem:[%s5909_s1 + $0x168] sm:$0xff]  ;;  %v4817_v2 = vpack.c.bf16 %v60_v63, %v59_v62  ;;  %v62_v5 = vld [vmem:[%s5909_s1 + $0x138] sm:$0xff]  ;;  %v69_v6 = vld [vmem:[%s5909_s1 + $0x170] sm:$0xff] }
  0x1e   :  { %4804 = vmatpush3.bf16.msra.mxu1 %v4801_v43  ;;  %4790 = vmatprep.subr.bf16.mxu0 %v4789_v48  ;;  %v4833_v3 = vpack.c.bf16 %v68_v1, %v67_v0  ;;  %v70_v7 = vld [vmem:[%s5909_s1 + $0x178] sm:$0xff]  ;;  %v4821_v8 = vpack.c.bf16 %v62_v5, %v61_v4  ;;  %v71_v10 = vld [vmem:[%s5909_s1 + $0x180] sm:$0xff]  ;;  %v72_v11 = vld [vmem:[%s5909_s1 + $0x188] sm:$0xff] }
  0x1f   :  { %4806 = vmatprep.subr.bf16.mxu1 %v4805_v49  ;;  %v4837_v9 = vpack.c.bf16 %v70_v7, %v69_v6  ;;  %v79_v12 = vld [vmem:[%s5909_s1 + $0x1c0] sm:$0xff]  ;;  %v80_v13 = vld [vmem:[%s5909_s1 + $0x1c8] sm:$0xff]  ;;  %v4841_v14 = vpack.c.bf16 %v72_v11, %v71_v10  ;;  %v73_v16 = vld [vmem:[%s5909_s1 + $0x190] sm:$0xff] }
  0x20   :  { %v4857_v15 = vpack.c.bf16 %v80_v13, %v79_v12  ;;  %v74_v18 = vld [vmem:[%s5909_s1 + $0x198] sm:$0xff]  ;;  %v81_v19 = vld [vmem:[%s5909_s1 + $0x1d0] sm:$0xff]  ;;  %v75_v23 = vld [vmem:[%s5909_s1 + $0x1a0] sm:$0xff] }
  0x21   :  { %4792 = vmatpush3.bf16.msra.mxu0 %v4789_v48  ;;  %v82_v20 = vld [vmem:[%s5909_s1 + $0x1d8] sm:$0xff]  ;;  %v4845_v21 = vpack.c.bf16 %v74_v18, %v73_v16  ;;  %v76_v24 = vld [vmem:[%s5909_s1 + $0x1a8] sm:$0xff]  ;;  %v83_v25 = vld [vmem:[%s5909_s1 + $0x1e0] sm:$0xff] }
  0x22   :  { %4808 = vmatpush3.bf16.msra.mxu1 %v4805_v49  ;;  %4810 = vmatprep.subr.bf16.mxu0 %v4809_v54  ;;  %v4861_v22 = vpack.c.bf16 %v82_v20, %v81_v19  ;;  %v84_v26 = vld [vmem:[%s5909_s1 + $0x1e8] sm:$0xff]  ;;  %v4849_v27 = vpack.c.bf16 %v76_v24, %v75_v23  ;;  %v77_v29 = vld [vmem:[%s5909_s1 + $0x1b0] sm:$0xff]  ;;  %v78_v30 = vld [vmem:[%s5909_s1 + $0x1b8] sm:$0xff] }
  0x23   :  { %4826 = vmatprep.subr.bf16.mxu1 %v4825_v55  ;;  %v4865_v28 = vpack.c.bf16 %v84_v26, %v83_v25  ;;  %v85_v31 = vld [vmem:[%s5909_s1 + $0x1f0] sm:$0xff]  ;;  %v86_v32 = vld [vmem:[%s5909_s1 + $0x1f8] sm:$0xff]  ;;  %v4853_v33 = vpack.c.bf16 %v78_v30, %v77_v29  ;;  %v694_v36 = vld [vmem:[%s5910_s2] sm:$0xff] }
  0x24   :  { %4336 = vmatmul.mubr.msk.f32.vlgmr.msra.gmra.mrb[2].mxu0 %vm87_vm0, %v5213_v35  ;;  %v4869_v34 = vpack.c.bf16 %v86_v32, %v85_v31  ;;  %v695_v37 = vld [vmem:[%s5910_s2 + $0x8] sm:$0xff]  ;;  %v696_v39 = vld [vmem:[%s5910_s2 + $0x10] sm:$0xff]  ;;  %v697_v40 = vld [vmem:[%s5910_s2 + $0x18] sm:$0xff] }
  0x25   :  { %4355 = vmatmul.mubr.msk.f32.vlgmr.msra.gmra.mrb[2].mxu1 %vm87_vm0, %v5213_v35  ;;  %4812 = vmatpush3.bf16.msra.mxu0 %v4809_v54  ;;  %v4873_v38 = vpack.c.bf16 %v695_v37, %v694_v36  ;;  %v702_v41 = vld [vmem:[%s5910_s2 + $0x40] sm:$0xff]  ;;  %v4877_v42 = vpack.c.bf16 %v697_v40, %v696_v39  ;;  %v703_v43 = vld [vmem:[%s5910_s2 + $0x48] sm:$0xff]  ;;  %v704_v47 = vld [vmem:[%s5910_s2 + $0x50] sm:$0xff] }
  0x26   :  { %4828 = vmatpush3.bf16.msra.mxu1 %v4825_v55  ;;  %4814 = vmatprep.subr.bf16.mxu0 %v4813_v60  ;;  %v4889_v44 = vpack.c.bf16 %v703_v43, %v702_v41  ;;  %v698_v45 = vld [vmem:[%s5910_s2 + $0x20] sm:$0xff]  ;;  %v699_v46 = vld [vmem:[%s5910_s2 + $0x28] sm:$0xff]  ;;  %v705_v49 = vld [vmem:[%s5910_s2 + $0x58] sm:$0xff] }
  0x27   :  { %4830 = vmatprep.subr.bf16.mxu1 %v4829_v61  ;;  %4373 = vmatprep.mubr.msk.f32.mxu0 %vm87_vm0, %v5168_v17  ;;  %v4881_v48 = vpack.c.bf16 %v699_v46, %v698_v45  ;;  %v4893_v50 = vpack.c.bf16 %v705_v49, %v704_v47  ;;  %v700_v51 = vld [vmem:[%s5910_s2 + $0x30] sm:$0xff]  ;;  %v701_v52 = vld [vmem:[%s5910_s2 + $0x38] sm:$0xff]  ;;  %v706_v53 = vld [vmem:[%s5910_s2 + $0x60] sm:$0xff] }
  0x28   :  { %4392 = vmatprep.mubr.msk.f32.mxu1 %vm87_vm0, %v5168_v17  ;;  %v4885_v54 = vpack.c.bf16 %v701_v52, %v700_v51  ;;  %v707_v55 = vld [vmem:[%s5910_s2 + $0x68] sm:$0xff]  ;;  %v708_v57 = vld [vmem:[%s5910_s2 + $0x70] sm:$0xff]  ;;  %v709_v58 = vld [vmem:[%s5910_s2 + $0x78] sm:$0xff] }
  0x29   :  { %4816 = vmatpush3.bf16.msra.mxu0 %v4813_v60  ;;  %v4897_v56 = vpack.c.bf16 %v707_v55, %v706_v53  ;;  %v710_v59 = vld [vmem:[%s5910_s2 + $0x80] sm:$0xff]  ;;  %v4901_v60 = vpack.c.bf16 %v709_v58, %v708_v57  ;;  %v712_v63 = vld [vmem:[%s5910_s2 + $0x90] sm:$0xff]  ;;  %v713_v0 = vld [vmem:[%s5910_s2 + $0x98] sm:$0xff] }
  0x2a   :  { %4832 = vmatpush3.bf16.msra.mxu1 %v4829_v61  ;;  %4818 = vmatprep.subr.bf16.mxu0 %v4817_v2  ;;  %v711_v61 = vld [vmem:[%s5910_s2 + $0x88] sm:$0xff]  ;;  %v718_v1 = vld [vmem:[%s5910_s2 + $0xc0] sm:$0xff]  ;;  %v720_v7 = vld [vmem:[%s5910_s2 + $0xd0] sm:$0xff] }
  0x2b   :  { %4834 = vmatprep.subr.bf16.mxu1 %v4833_v3  ;;  %v4905_v62 = vpack.c.bf16 %v711_v61, %v710_v59  ;;  %v714_v5 = vld [vmem:[%s5910_s2 + $0xa0] sm:$0xff]  ;;  %v715_v6 = vld [vmem:[%s5910_s2 + $0xa8] sm:$0xff]  ;;  %v716_v10 = vld [vmem:[%s5910_s2 + $0xb0] sm:$0xff] }
  0x2c   :  { %v717_v11 = vld [vmem:[%s5910_s2 + $0xb8] sm:$0xff]  ;;  %v722_v13 = vld [vmem:[%s5910_s2 + $0xe0] sm:$0xff]  ;;  %v724_v18 = vld [vmem:[%s5910_s2 + $0xf0] sm:$0xff] }
  0x2d   :  { %4820 = vmatpush3.bf16.msra.mxu0 %v4817_v2  ;;  %v4909_v2 = vpack.c.bf16 %v713_v0, %v712_v63  ;;  %v725_v19 = vld [vmem:[%s5910_s2 + $0xf8] sm:$0xff]  ;;  %v726_v20 = vld [vmem:[%s5910_s2 + $0x100] sm:$0xff]  ;;  %v728_v24 = vld [vmem:[%s5910_s2 + $0x110] sm:$0xff] }
  0x2e   :  { %4836 = vmatpush3.bf16.msra.mxu1 %v4833_v3  ;;  %4822 = vmatprep.subr.bf16.mxu0 %v4821_v8  ;;  %v719_v3 = vld [vmem:[%s5910_s2 + $0xc8] sm:$0xff]  ;;  %v729_v25 = vld [vmem:[%s5910_s2 + $0x118] sm:$0xff]  ;;  %v734_v26 = vld [vmem:[%s5910_s2 + $0x140] sm:$0xff] }
  0x2f   :  { %4838 = vmatprep.subr.bf16.mxu1 %v4837_v9  ;;  %v4921_v4 = vpack.c.bf16 %v719_v3, %v718_v1  ;;  %v730_v30 = vld [vmem:[%s5910_s2 + $0x120] sm:$0xff]  ;;  %v731_v31 = vld [vmem:[%s5910_s2 + $0x128] sm:$0xff]  ;;  %v736_v32 = vld [vmem:[%s5910_s2 + $0x150] sm:$0xff] }
  0x30   :  { %v732_v37 = vld [vmem:[%s5910_s2 + $0x130] sm:$0xff]  ;;  %v738_v39 = vld [vmem:[%s5910_s2 + $0x160] sm:$0xff]  ;;  %v739_v40 = vld [vmem:[%s5910_s2 + $0x168] sm:$0xff] }
  0x31   :  { %4824 = vmatpush3.bf16.msra.mxu0 %v4821_v8  ;;  %v4913_v8 = vpack.c.bf16 %v715_v6, %v714_v5  ;;  %v740_v43 = vld [vmem:[%s5910_s2 + $0x170] sm:$0xff]  ;;  %v742_v45 = vld [vmem:[%s5910_s2 + $0x180] sm:$0xff]  ;;  %v743_v46 = vld [vmem:[%s5910_s2 + $0x188] sm:$0xff]  ;;  %v5092_v6 = vmov 0.0  }
  0x32   :  { %4840 = vmatpush3.bf16.msra.mxu1 %v4837_v9  ;;  %4842 = vmatprep.subr.bf16.mxu0 %v4841_v14  ;;  %v721_v9 = vld [vmem:[%s5910_s2 + $0xd8] sm:$0xff]  ;;  %v744_v49 = vld [vmem:[%s5910_s2 + $0x190] sm:$0xff]  ;;  %v750_v51 = vld [vmem:[%s5910_s2 + $0x1c0] sm:$0xff] }
  0x33   :  { %4858 = vmatprep.subr.bf16.mxu1 %v4857_v15  ;;  %v4925_v12 = vpack.c.bf16 %v721_v9, %v720_v7  ;;  %v751_v52 = vld [vmem:[%s5910_s2 + $0x1c8] sm:$0xff]  ;;  %v746_v55 = vld [vmem:[%s5910_s2 + $0x1a0] sm:$0xff]  ;;  %v752_v57 = vld [vmem:[%s5910_s2 + $0x1d0] sm:$0xff] }
  0x34   :  { %4374 = vmatmul.mubr.msk.f32.vlgmr.msra.gmra.mrb[4].mxu0 %vm87_vm0, %v5213_v35  ;;  %v753_v58 = vld [vmem:[%s5910_s2 + $0x1d8] sm:$0xff]  ;;  %v748_v61 = vld [vmem:[%s5910_s2 + $0x1b0] sm:$0xff]  ;;  %v754_v63 = vld [vmem:[%s5910_s2 + $0x1e0] sm:$0xff] }
  0x35   :  { %4393 = vmatmul.mubr.msk.f32.vlgmr.msra.gmra.mrb[4].mxu1 %vm87_vm0, %v5213_v35  ;;  %4844 = vmatpush3.bf16.msra.mxu0 %v4841_v14  ;;  %v723_v14 = vld [vmem:[%s5910_s2 + $0xe8] sm:$0xff]  ;;  %v756_v3 = vld [vmem:[%s5910_s2 + $0x1f0] sm:$0xff] }
  0x36   :  { %4860 = vmatpush3.bf16.msra.mxu1 %v4857_v15  ;;  %4846 = vmatprep.subr.bf16.mxu0 %v4845_v21  ;;  %v4917_v15 = vpack.c.bf16 %v717_v11, %v716_v10  ;;  %v4929_v16 = vpack.c.bf16 %v723_v14, %v722_v13  ;;  %v755_v0 = vld [vmem:[%s5910_s2 + $0x1e8] sm:$0xff] }
  0x37   :  { %4862 = vmatprep.subr.bf16.mxu1 %v4861_v22  ;;  %4411 = vmatprep.mubr.msk.f32.mxu0 %vm87_vm0, %v5168_v17 }
  0x38   :  { %4430 = vmatprep.mubr.msk.f32.mxu1 %vm87_vm0, %v5168_v17 }
  0x39   :  { %4848 = vmatpush3.bf16.msra.mxu0 %v4845_v21  ;;  %v727_v21 = vld [vmem:[%s5910_s2 + $0x108] sm:$0xff] }
  0x3a   :  { %4864 = vmatpush3.bf16.msra.mxu1 %v4861_v22  ;;  %4850 = vmatprep.subr.bf16.mxu0 %v4849_v27  ;;  %v4933_v22 = vpack.c.bf16 %v725_v19, %v724_v18  ;;  %v4937_v23 = vpack.c.bf16 %v727_v21, %v726_v20 }
  0x3b   :  { %4866 = vmatprep.subr.bf16.mxu1 %v4865_v28 }
  0x3d   :  { %4852 = vmatpush3.bf16.msra.mxu0 %v4849_v27  ;;  %v735_v27 = vld [vmem:[%s5910_s2 + $0x148] sm:$0xff] }
  0x3e   :  { %4868 = vmatpush3.bf16.msra.mxu1 %v4865_v28  ;;  %4854 = vmatprep.subr.bf16.mxu0 %v4853_v33  ;;  %v4941_v28 = vpack.c.bf16 %v729_v25, %v728_v24  ;;  %v4953_v29 = vpack.c.bf16 %v735_v27, %v734_v26 }
  0x3f   :  { %4870 = vmatprep.subr.bf16.mxu1 %v4869_v34 }
  0x41   :  { %4856 = vmatpush3.bf16.msra.mxu0 %v4853_v33  ;;  %v737_v33 = vld [vmem:[%s5910_s2 + $0x158] sm:$0xff] }
  0x42   :  { %4872 = vmatpush3.bf16.msra.mxu1 %v4869_v34  ;;  %4874 = vmatprep.subr.bf16.mxu0 %v4873_v38  ;;  %v4945_v34 = vpack.c.bf16 %v731_v31, %v730_v30  ;;  %v4957_v36 = vpack.c.bf16 %v737_v33, %v736_v32 }
  0x43   :  { %4890 = vmatprep.subr.bf16.mxu1 %v4889_v44 }
  0x44   :  { %4412 = vmatmul.mubr.msk.f32.vlgmr.msra.gmra.mrb[6].mxu0 %vm87_vm0, %v5213_v35 }
  0x45   :  { %4431 = vmatmul.mubr.msk.f32.vlgmr.msra.gmra.mrb[6].mxu1 %vm87_vm0, %v5213_v35  ;;  %4449 = vmatprep.mubr.msk.f32.mxu0 %vm87_vm0, %v5168_v17 }
  0x46   :  { %4468 = vmatprep.mubr.msk.f32.mxu1 %vm87_vm0, %v5168_v17  ;;  %4876 = vmatpush3.bf16.msra.mxu0 %v4873_v38  ;;  %v733_v38 = vld [vmem:[%s5910_s2 + $0x138] sm:$0xff] }
  0x47   :  { %4878 = vmatprep.subr.bf16.mxu0 %v4877_v42  ;;  %4892 = vmatpush3.bf16.msra.mxu1 %v4889_v44  ;;  %v4949_v41 = vpack.c.bf16 %v733_v38, %v732_v37  ;;  %v741_v44 = vld [vmem:[%s5910_s2 + $0x178] sm:$0xff] }
  0x48   :  { %4894 = vmatprep.subr.bf16.mxu1 %v4893_v50  ;;  %v4965_v47 = vpack.c.bf16 %v741_v44, %v740_v43 }
  0x4a   :  { %4880 = vmatpush3.bf16.msra.mxu0 %v4877_v42  ;;  %v4961_v42 = vpack.c.bf16 %v739_v40, %v738_v39 }
  0x4b   :  { %4882 = vmatprep.subr.bf16.mxu0 %v4881_v48  ;;  %4896 = vmatpush3.bf16.msra.mxu1 %v4893_v50  ;;  %v745_v50 = vld [vmem:[%s5910_s2 + $0x198] sm:$0xff] }
  0x4c   :  { %4898 = vmatprep.subr.bf16.mxu1 %v4897_v56  ;;  %v4973_v53 = vpack.c.bf16 %v745_v50, %v744_v49 }
  0x4e   :  { %4884 = vmatpush3.bf16.msra.mxu0 %v4881_v48  ;;  %v4969_v48 = vpack.c.bf16 %v743_v46, %v742_v45 }
  0x4f   :  { %4886 = vmatprep.subr.bf16.mxu0 %v4885_v54  ;;  %4900 = vmatpush3.bf16.msra.mxu1 %v4897_v56  ;;  %v747_v56 = vld [vmem:[%s5910_s2 + $0x1a8] sm:$0xff] }
  0x50   :  { %4902 = vmatprep.subr.bf16.mxu1 %v4901_v60  ;;  %v4977_v59 = vpack.c.bf16 %v747_v56, %v746_v55 }
  0x52   :  { %4888 = vmatpush3.bf16.msra.mxu0 %v4885_v54  ;;  %v4985_v54 = vpack.c.bf16 %v751_v52, %v750_v51 }
  0x53   :  { %4906 = vmatprep.subr.bf16.mxu0 %v4905_v62  ;;  %4904 = vmatpush3.bf16.msra.mxu1 %v4901_v60  ;;  %v4989_v60 = vpack.c.bf16 %v753_v58, %v752_v57 }
  0x54   :  { %4922 = vmatprep.subr.bf16.mxu1 %v4921_v4 }
  0x55   :  { %4450 = vmatmul.mubr.msk.f32.vlgmr.msra.gmra.mrb[8].mxu0 %vm87_vm0, %v5213_v35 }
  0x56   :  { %4487 = vmatprep.mubr.msk.f32.mxu0 %vm87_vm0, %v5168_v17  ;;  %4908 = vmatpush3.bf16.msra.mxu0 %v4905_v62  ;;  %v749_v62 = vld [vmem:[%s5910_s2 + $0x1b8] sm:$0xff] }
  0x57   :  { %4910 = vmatprep.subr.bf16.mxu0 %v4909_v2  ;;  %4469 = vmatmul.mubr.msk.f32.vlgmr.msra.gmra.mrb[8].mxu1 %vm87_vm0, %v5213_v35  ;;  %v4981_v1 = vpack.c.bf16 %v749_v62, %v748_v61 }
  0x58   :  { %4924 = vmatpush3.bf16.msra.mxu1 %v4921_v4  ;;  %4506 = vmatprep.mubr.msk.f32.mxu1 %vm87_vm0, %v5168_v17  ;;  %v757_v4 = vld [vmem:[%s5910_s2 + $0x1f8] sm:$0xff]  ;;  %s5094_s2 = smov 120  }
  0x59   :  { %4926 = vmatprep.subr.bf16.mxu1 %v4925_v12  ;;  %v4997_v5 = vpack.c.bf16 %v757_v4, %v756_v3 }
  0x5a   :  { %4912 = vmatpush3.bf16.msra.mxu0 %v4909_v2  ;;  %v4993_v2 = vpack.c.bf16 %v755_v0, %v754_v63 }
  0x5b   :  { %4914 = vmatprep.subr.bf16.mxu0 %v4913_v8 }
  0x5c   :  { %4928 = vmatpush3.bf16.msra.mxu1 %v4925_v12 }
  0x5d   :  { %4930 = vmatprep.subr.bf16.mxu1 %v4929_v16 }
  0x5e   :  { %4916 = vmatpush3.bf16.msra.mxu0 %v4913_v8 }
  0x5f   :  { %4918 = vmatprep.subr.bf16.mxu0 %v4917_v15 }
  0x60   :  { %4932 = vmatpush3.bf16.msra.mxu1 %v4929_v16 }
  0x61   :  { %4934 = vmatprep.subr.bf16.mxu1 %v4933_v22 }
  0x62   :  { %4920 = vmatpush3.bf16.msra.mxu0 %v4917_v15 }
  0x63   :  { %4938 = vmatprep.subr.bf16.mxu0 %v4937_v23 }
  0x64   :  { %4936 = vmatpush3.bf16.msra.mxu1 %v4933_v22 }
  0x65   :  { %4488 = vmatmul.mubr.msk.f32.vlgmr.msra.gmra.mrb[10].mxu0 %vm87_vm0, %v5213_v35  ;;  %4954 = vmatprep.subr.bf16.mxu1 %v4953_v29 }
  0x66   :  { %4940 = vmatpush3.bf16.msra.mxu0 %v4937_v23  ;;  %4525 = vmatprep.mubr.msk.f32.mxu0 %vm87_vm0, %v5168_v17 }
  0x67   :  { %4942 = vmatprep.subr.bf16.mxu0 %v4941_v28  ;;  %4507 = vmatmul.mubr.msk.f32.vlgmr.msra.gmra.mrb[10].mxu1 %vm87_vm0, %v5213_v35 }
  0x68   :  { %4956 = vmatpush3.bf16.msra.mxu1 %v4953_v29  ;;  %4544 = vmatprep.mubr.msk.f32.mxu1 %vm87_vm0, %v5168_v17 }
  0x69   :  { %4958 = vmatprep.subr.bf16.mxu1 %v4957_v36 }
  0x6a   :  { %4944 = vmatpush3.bf16.msra.mxu0 %v4941_v28 }
  0x6b   :  { %4946 = vmatprep.subr.bf16.mxu0 %v4945_v34 }
  0x6c   :  { %4960 = vmatpush3.bf16.msra.mxu1 %v4957_v36 }
  0x6d   :  { %4962 = vmatprep.subr.bf16.mxu1 %v4961_v42 }
  0x6e   :  { %4948 = vmatpush3.bf16.msra.mxu0 %v4945_v34 }
  0x6f   :  { %4950 = vmatprep.subr.bf16.mxu0 %v4949_v41 }
  0x70   :  { %4964 = vmatpush3.bf16.msra.mxu1 %v4961_v42 }
  0x71   :  { %4966 = vmatprep.subr.bf16.mxu1 %v4965_v47 }
  0x72   :  { %4952 = vmatpush3.bf16.msra.mxu0 %v4949_v41 }
  0x73   :  { %4970 = vmatprep.subr.bf16.mxu0 %v4969_v48 }
  0x74   :  { %4968 = vmatpush3.bf16.msra.mxu1 %v4965_v47 }
  0x75   :  { %4526 = vmatmul.mubr.msk.f32.vlgmr.msra.gmra.mrb[12].mxu0 %vm87_vm0, %v5213_v35  ;;  %4986 = vmatprep.subr.bf16.mxu1 %v4985_v54 }
  0x76   :  { %4972 = vmatpush3.bf16.msra.mxu0 %v4969_v48  ;;  %4563 = vmatprep.mubr.msk.f32.mxu0 %vm87_vm0, %v5168_v17 }
  0x77   :  { %4974 = vmatprep.subr.bf16.mxu0 %v4973_v53  ;;  %4545 = vmatmul.mubr.msk.f32.vlgmr.msra.gmra.mrb[12].mxu1 %vm87_vm0, %v5213_v35 }
  0x78   :  { %4988 = vmatpush3.bf16.msra.mxu1 %v4985_v54  ;;  %4582 = vmatprep.mubr.msk.f32.mxu1 %vm87_vm0, %v5168_v17 }
  0x79   :  { %4990 = vmatprep.subr.bf16.mxu1 %v4989_v60 }
  0x7a   :  { %4976 = vmatpush3.bf16.msra.mxu0 %v4973_v53 }
  0x7b   :  { %4978 = vmatprep.subr.bf16.mxu0 %v4977_v59 }
  0x7c   :  { %4992 = vmatpush3.bf16.msra.mxu1 %v4989_v60 }
  0x7d   :  { %4994 = vmatprep.subr.bf16.mxu1 %v4993_v2 }
  0x7e   :  { %4980 = vmatpush3.bf16.msra.mxu0 %v4977_v59 }
  0x7f   :  { %4982 = vmatprep.subr.bf16.mxu0 %v4981_v1 }
  0x80   :  { %4996 = vmatpush3.bf16.msra.mxu1 %v4993_v2 }
  0x81   :  { %4998 = vmatprep.subr.bf16.mxu1 %v4997_v5 }
  0x82   :  { %4984 = vmatpush3.bf16.msra.mxu0 %v4981_v1 }
  0x83   :  { %4585 = vmatprep.subr.mxu0 %v5092_v6 }
  0x84   :  { %5000 = vmatpush3.bf16.msra.mxu1 %v4997_v5 }
  0x85   :  { %4564 = vmatmul.mubr.msk.f32.vlgmr.msra.gmra.mrb[14].mxu0 %vm87_vm0, %v5213_v35  ;;  %4590 = vmatprep.subr.mxu1 %v5092_v6 }
  0x86   :  { %4587 = vmatprep.mubr.msk.f32.mxu0 %vm5093_vm1, %v5092_v6 }
  0x87   :  { %4583 = vmatmul.mubr.msk.f32.vlgmr.msra.gmra.mrb[14].mxu1 %vm87_vm0, %v5213_v35 }
  0x88   :  { %4592 = vmatprep.mubr.msk.f32.mxu1 %vm5093_vm1, %v5092_v6 }
  0xe7   :  { %v5593_v17 = vpop.f32.mrb[0].mxu0 }
  0xe8   :  { %v5595_v7 = vpop.f32.mrb[0].mxu1  ;;  %v160_v8 = vpop.f32.mrb[1].mxu0 }
  0xe9   :  { %v235_v9 = vpop.f32.mrb[1].mxu1  ;;  %1360 = vrot.lane.b32.xlu0 %v160_v8, %s5094_s2 }
  0xed   :  { %1438 = vrot.lane.b32.xlu0 %v235_v9, %s5094_s2 }
  0xf7   :  { %v5597_v10 = vpop.f32.mrb[2].mxu0 }
  0xf8   :  { %v5599_v11 = vpop.f32.mrb[2].mxu1  ;;  %v310_v35 = vpop.f32.mrb[3].mxu0 }
  0xf9   :  { %v385_v12 = vpop.f32.mrb[3].mxu1  ;;  %1515 = vrot.lane.b32.xlu1 %v310_v35, %s5094_s2 }
  0xfd   :  { %1592 = vrot.lane.b32.xlu1 %v385_v12, %s5094_s2 }
 0x107   :  { %v5601_v13 = vpop.f32.mrb[4].mxu0 }
 0x108   :  { %v5603_v14 = vpop.f32.mrb[4].mxu1  ;;  %v460_v15 = vpop.f32.mrb[5].mxu0 }
 0x109   :  { %v535_v16 = vpop.f32.mrb[5].mxu1  ;;  %1669 = vrot.lane.b32.xlu0 %v460_v15, %s5094_s2 }
 0x10a   :  { %1746 = vrot.lane.b32.xlu1 %v535_v16, %s5094_s2 }
 0x117   :  { %v5605_v18 = vpop.f32.mrb[6].mxu0 }
 0x118   :  { %v5607_v19 = vpop.f32.mrb[6].mxu1  ;;  %v610_v20 = vpop.f32.mrb[7].mxu0 }
 0x119   :  { %v685_v21 = vpop.f32.mrb[7].mxu1  ;;  %1823 = vrot.lane.b32.xlu0 %v610_v20, %s5094_s2 }
 0x11a   :  { %1900 = vrot.lane.b32.xlu1 %v685_v21, %s5094_s2 }
 0x11d   :  { %2655 = vrot.lane.b32.xlu0 %v5593_v17, %s5094_s2 }
 0x11e   :  { %2732 = vrot.lane.b32.xlu1 %v5595_v7, %s5094_s2 }
 0x121   :  { %2809 = vrot.lane.b32.xlu0 %v5597_v10, %s5094_s2 }
 0x122   :  { %2886 = vrot.lane.b32.xlu1 %v5599_v11, %s5094_s2 }
 0x125   :  { %2963 = vrot.lane.b32.xlu0 %v5601_v13, %s5094_s2 }
 0x126   :  { %3040 = vrot.lane.b32.xlu1 %v5603_v14, %s5094_s2 }
 0x128   :  { %v5637_v26 = vpop.f32.mrb[8].mxu0 }
 0x129   :  { %3117 = vrot.lane.b32.xlu0 %v5605_v18, %s5094_s2  ;;  %v824_v28 = vpop.f32.mrb[9].mxu0 }
 0x12a   :  { %3194 = vrot.lane.b32.xlu1 %v5607_v19, %s5094_s2  ;;  %v5644_v30 = vpop.f32.mrb[8].mxu1 }
 0x12b   :  { %v899_v31 = vpop.f32.mrb[9].mxu1 }
 0x138   :  { %v5651_v33 = vpop.f32.mrb[10].mxu0 }
 0x139   :  { %v5654_v36 = vpop.f32.mrb[11].mxu0 }
 0x13a   :  { %v5660_v37 = vpop.f32.mrb[10].mxu1 }
 0x13b   :  { %v5663_v38 = vpop.f32.mrb[11].mxu1 }
 0x148   :  { %v5671_v39 = vpop.f32.mrb[12].mxu0 }
 0x149   :  { %v5673_v40 = vpop.f32.mrb[13].mxu0 }
 0x14a   :  { %v5675_v41 = vpop.f32.mrb[12].mxu1 }
 0x14b   :  { %v5681_v44 = vpop.f32.mrb[13].mxu1 }
 0x158   :  { %v5677_v42 = vpop.f32.mrb[14].mxu0 }
 0x159   :  { %v5679_v43 = vpop.f32.mrb[15].mxu0 }
 0x15a   :  { %v5683_v45 = vpop.f32.mrb[14].mxu1 }
 0x15b   :  { %v1361_v22 = vpop.permute.xlu0 %1360  ;;  %v5685_v46 = vpop.f32.mrb[15].mxu1 }
 0x15c   :  { %4586 = vmatpush3.xpose.msk.msra.mxu0 %vm1362_vm2, %v1361_v22 }
 0x15d   :  { %4595 = vmatprep.subr.mxu0 %v5092_v6 }
 0x15f   :  { %4588 = vmatmul.mubr.msk.f32.vlgmr.msra.gmra.mrb[16].mxu0 %vm1362_vm2, %v160_v8  ;;  %v1439_v23 = vpop.permute.xlu0 %1438 }
 0x160   :  { %4591 = vmatpush3.xpose.msk.msra.mxu1 %vm1362_vm2, %v1439_v23  ;;  %4597 = vmatprep.mubr.msk.f32.mxu0 %vm5093_vm1, %v5092_v6 }
 0x161   :  { %4600 = vmatprep.subr.mxu1 %v5092_v6 }
 0x163   :  { %4593 = vmatmul.mubr.msk.f32.vlgmr.msra.gmra.mrb[16].mxu1 %vm1362_vm2, %v235_v9 }
 0x164   :  { %4602 = vmatprep.mubr.msk.f32.mxu1 %vm5093_vm1, %v5092_v6 }
 0x16b   :  { %v1516_v24 = vpop.permute.xlu1 %1515 }
 0x16c   :  { %4596 = vmatpush3.xpose.msk.msra.mxu0 %vm1362_vm2, %v1516_v24 }
 0x16d   :  { %4605 = vmatprep.subr.mxu0 %v5092_v6 }
 0x16f   :  { %4598 = vmatmul.mubr.msk.f32.vlgmr.msra.gmra.mrb[18].mxu0 %vm1362_vm2, %v310_v35  ;;  %v1593_v25 = vpop.permute.xlu1 %1592 }
 0x170   :  { %4601 = vmatpush3.xpose.msk.msra.mxu1 %vm1362_vm2, %v1593_v25  ;;  %4607 = vmatprep.mubr.msk.f32.mxu0 %vm5093_vm1, %v5092_v6 }
 0x171   :  { %4610 = vmatprep.subr.mxu1 %v5092_v6 }
 0x173   :  { %4603 = vmatmul.mubr.msk.f32.vlgmr.msra.gmra.mrb[18].mxu1 %vm1362_vm2, %v385_v12 }
 0x174   :  { %4612 = vmatprep.mubr.msk.f32.mxu1 %vm5093_vm1, %v5092_v6 }
 0x17b   :  { %v1670_v27 = vpop.permute.xlu0 %1669 }
 0x17c   :  { %v1747_v29 = vpop.permute.xlu1 %1746  ;;  %4606 = vmatpush3.xpose.msk.msra.mxu0 %vm1362_vm2, %v1670_v27 }
 0x17d   :  { %4611 = vmatpush3.xpose.msk.msra.mxu1 %vm1362_vm2, %v1747_v29  ;;  %4615 = vmatprep.subr.mxu0 %v5092_v6 }
 0x17e   :  { %4620 = vmatprep.subr.mxu1 %v5092_v6 }
 0x17f   :  { %4608 = vmatmul.mubr.msk.f32.vlgmr.msra.gmra.mrb[20].mxu0 %vm1362_vm2, %v460_v15 }
 0x180   :  { %4613 = vmatmul.mubr.msk.f32.vlgmr.msra.gmra.mrb[20].mxu1 %vm1362_vm2, %v535_v16  ;;  %4617 = vmatprep.mubr.msk.f32.mxu0 %vm5093_vm1, %v5092_v6 }
 0x181   :  { %4622 = vmatprep.mubr.msk.f32.mxu1 %vm5093_vm1, %v5092_v6 }
 0x18b   :  { %v1824_v32 = vpop.permute.xlu0 %1823 }
 0x18c   :  { %v1901_v34 = vpop.permute.xlu1 %1900  ;;  %4616 = vmatpush3.xpose.msk.msra.mxu0 %vm1362_vm2, %v1824_v32 }
 0x18d   :  { %4621 = vmatpush3.xpose.msk.msra.mxu1 %vm1362_vm2, %v1901_v34  ;;  %4625 = vmatprep.subr.mxu0 %v5092_v6 }
 0x18e   :  { %4630 = vmatprep.subr.mxu1 %v5092_v6 }
 0x18f   :  { %4618 = vmatmul.mubr.msk.f32.vlgmr.msra.gmra.mrb[22].mxu0 %vm1362_vm2, %v610_v20 }
 0x190   :  { %4623 = vmatmul.mubr.msk.f32.vlgmr.msra.gmra.mrb[22].mxu1 %vm1362_vm2, %v685_v21  ;;  %4626 = vmatpush3.msra.mxu0 %v824_v28 }
 0x191   :  { %4631 = vmatpush3.msra.mxu1 %v899_v31  ;;  %4627 = vmatprep.mubr.msk.f32.mxu0 %vm5093_vm1, %v5092_v6 }
 0x192   :  { %4632 = vmatprep.mubr.msk.f32.mxu1 %vm5093_vm1, %v5092_v6  ;;  %4635 = vmatprep.subr.mxu0 %v5092_v6 }
 0x193   :  { %4640 = vmatprep.subr.mxu1 %v5092_v6 }
 0x232   :  { %v1433_v47 = vpop.f32.mrb[16].mxu0 }
 0x233   :  { %v4589_v48 = vpop.f32.mrb[17].mxu0  ;;  %v1976_v56 = vsel %vm1362_vm2, %v1433_v47, -inf }
 0x236   :  { %v1510_v49 = vpop.f32.mrb[16].mxu1 }
 0x237   :  { %v4594_v50 = vpop.f32.mrb[17].mxu1  ;;  %v1977_v60 = vsel %vm1362_vm2, %v1510_v49, -inf }
 0x242   :  { %v1587_v51 = vpop.f32.mrb[18].mxu0 }
 0x243   :  { %v4599_v52 = vpop.f32.mrb[19].mxu0  ;;  %v1978_v3 = vsel %vm1362_vm2, %v1587_v51, -inf }
 0x246   :  { %v1664_v53 = vpop.f32.mrb[18].mxu1 }
 0x247   :  { %v4604_v54 = vpop.f32.mrb[19].mxu1  ;;  %v1979_v9 = vsel %vm1362_vm2, %v1664_v53, -inf }
 0x252   :  { %v1741_v55 = vpop.f32.mrb[20].mxu0 }
 0x253   :  { %v1980_v57 = vsel %vm1362_vm2, %v1741_v55, -inf  ;;  %v1818_v58 = vpop.f32.mrb[20].mxu1  ;;  %v4609_v59 = vpop.f32.mrb[21].mxu0 }
 0x254   :  { %v1981_v61 = vmax.f32 %v1976_v56, %v1980_v57  ;;  %v1982_v62 = vsel %vm1362_vm2, %v1818_v58, -inf  ;;  %v4614_v63 = vpop.f32.mrb[21].mxu1 }
 0x255   :  { %v1983_v0 = vmax.f32 %v1977_v60, %v1982_v62 }
 0x257   :  { %v1988_v1 = vmax.f32 %v1981_v61, %v1983_v0 }
 0x262   :  { %v1895_v2 = vpop.f32.mrb[22].mxu0 }
 0x263   :  { %v1984_v4 = vsel %vm1362_vm2, %v1895_v2, -inf  ;;  %v1972_v5 = vpop.f32.mrb[22].mxu1  ;;  %v4619_v8 = vpop.f32.mrb[23].mxu0 }
 0x264   :  { %v1985_v35 = vmax.f32 %v1978_v3, %v1984_v4  ;;  %v1986_v12 = vsel %vm1362_vm2, %v1972_v5, -inf  ;;  %v4624_v15 = vpop.f32.mrb[23].mxu1 }
 0x265   :  { %v1987_v16 = vmax.f32 %v1979_v9, %v1986_v12 }
 0x267   :  { %v1989_v20 = vmax.f32 %v1985_v35, %v1987_v16 }
 0x269   :  { %v1990_v21 = vmax.f32 %v1988_v1, %v1989_v20 }
 0x26b   :  { %v1991_v22 = vsub.f32 %v1433_v47, %v1990_v21  ;;  %v1992_v23 = vsub.f32 %v1510_v49, %v1990_v21  ;;  %v1993_v24 = vsub.f32 %v1587_v51, %v1990_v21  ;;  %v1994_v25 = vsub.f32 %v1664_v53, %v1990_v21 }
 0x26c   :  { %v1995_v27 = vsub.f32 %v1741_v55, %v1990_v21  ;;  %v1996_v28 = vsub.f32 %v1818_v58, %v1990_v21  ;;  %v1997_v29 = vsub.f32 %v1895_v2, %v1990_v21  ;;  %v1998_v31 = vsub.f32 %v1972_v5, %v1990_v21 }
 0x26d   :  { %v1999_v32 = vmul.f32 1.442695, %v1991_v22  ;;  %v2001_v34 = vmul.f32 1.442695, %v1992_v23  ;;  %v2003_v48 = vmul.f32 1.442695, %v1993_v24 }
 0x26e   :  { %v2005_v50 = vmul.f32 1.442695, %v1994_v25  ;;  %v2007_v52 = vmul.f32 1.442695, %v1995_v27  ;;  %v2009_v54 = vmul.f32 1.442695, %v1996_v28 }
 0x26f   :  { %5008 = vpow2.f32 %v1999_v32  ;;  %v2011_v56 = vmul.f32 1.442695, %v1997_v29  ;;  %v2013_v47 = vmul.f32 1.442695, %v1998_v31 }
 0x270   :  { %5010 = vpow2.f32 %v2001_v34 }
 0x271   :  { %5012 = vpow2.f32 %v2003_v48 }
 0x272   :  { %5014 = vpow2.f32 %v2005_v50 }
 0x273   :  { %5016 = vpow2.f32 %v2007_v52 }
 0x274   :  { %5018 = vpow2.f32 %v2009_v54 }
 0x275   :  { %5020 = vpow2.f32 %v2011_v56 }
 0x276   :  { %5022 = vpow2.f32 %v2013_v47 }
 0x279   :  { %v5009_v49 = vpop.eup %5008 }
 0x27a   :  { %v5011_v51 = vpop.eup %5010  ;;  %v2015_v53 = vsel %vm1362_vm2, %v5009_v49, 0.0 }
 0x27b   :  { %v5013_v55 = vpop.eup %5012  ;;  %v2016_v57 = vsel %vm1362_vm2, %v5011_v51, 0.0 }
 0x27c   :  { %v5015_v58 = vpop.eup %5014  ;;  %v2017_v59 = vadd.f32 %v2016_v57, %v2015_v53  ;;  %v2018_v60 = vsel %vm1362_vm2, %v5013_v55, 0.0 }
 0x27d   :  { %v5017_v61 = vpop.eup %5016  ;;  %v2020_v63 = vsel %vm1362_vm2, %v5015_v58, 0.0 }
 0x27e   :  { %v2019_v62 = vadd.f32 %v2018_v60, %v2017_v59  ;;  %v5019_v0 = vpop.eup %5018  ;;  %v2022_v2 = vsel %vm1362_vm2, %v5017_v61, 0.0 }
 0x27f   :  { %v5021_v3 = vpop.eup %5020  ;;  %v2024_v5 = vsel %vm1362_vm2, %v5019_v0, 0.0 }
 0x280   :  { %v2021_v1 = vadd.f32 %v2020_v63, %v2019_v62  ;;  %v5023_v8 = vpop.eup %5022  ;;  %v2026_v35 = vsel %vm1362_vm2, %v5021_v3, 0.0 }
 0x281   :  { %v2028_v15 = vsel %vm1362_vm2, %v5023_v8, 0.0 }
 0x282   :  { %v2023_v4 = vadd.f32 %v2022_v2, %v2021_v1  ;;  %v5809_v1 = vld [vmem:[%s5911_s3] ss:$0 sm:$0xff]  ;;  %s5095_s3 = smov [#allocation4]  }
 0x283   :  { %s3961_s17 = sshll.u32 %s5095_s3, 4  ;;  %s3962_s17 = int_to_ptr.vmem [resolvable:$true] %s3961_s17 }
 0x284   :  { %v2025_v9 = vadd.f32 %v2024_v5, %v2023_v4  ;;  %s5044_s18 = scalar_lea.vmem %s3962_s17, 2048  ;;  %p5049_p1 = scmp.lt.s32.totalorder %s3962_s17, %s3962_s17 }
 0x285   :  { %p5045_p0 = scmp.ne.s32.totalorder %s3962_s17, %s5044_s18  ;;  %p5050_p2 = scmp.lt.s32.totalorder %s5044_s18, %s5044_s18 }
 0x286   :  { %v2027_v12 = vadd.f32 %v2026_v35, %v2025_v9 }
 0x287   :  { %p5051_p3 = por %p5050_p2, %p5049_p1 }
 0x288   :  { %v2029_v16 = vadd.f32 %v2028_v15, %v2027_v12 }
 0x289   :  { %p5052_p4 = pnand %p5051_p3, %p5045_p0 }
 0x28a   :  { %5024 = vrcp.f32 %v2029_v16 }
 0x294   :  { %v5025_v20 = vpop.eup %5024 }
 0x295   :  { %v2031_v21 = vmul.f32 %v5025_v20, %v5009_v49  ;;  %v2032_v22 = vmul.f32 %v5025_v20, %v5011_v51  ;;  %v2033_v23 = vmul.f32 %v5025_v20, %v5013_v55  ;;  %v2034_v24 = vmul.f32 %v5025_v20, %v5015_v58 }
 0x296   :  { %v2035_v25 = vmul.f32 %v5025_v20, %v5017_v61  ;;  %v2036_v27 = vmul.f32 %v5025_v20, %v5019_v0  ;;  %v2037_v28 = vmul.f32 %v5025_v20, %v5021_v3  ;;  %v2038_v29 = vmul.f32 %v5025_v20, %v5023_v8 }
 0x297   :  { %2039 = vst.msk [vmem:[#allocation4] sm:$0xff] %vm1362_vm2, %v2031_v21  ;;  %4628 = vmatmul.mubr.msk.f32.vlgmr.msra.gmra.mrb[24].mxu0 %vm1362_vm2, %v2031_v21  ;;  %2040 = vst.msk [vmem:[#allocation4 + $0x8] sm:$0xff] %vm1362_vm2, %v2032_v22  ;;  %4633 = vmatmul.mubr.msk.f32.vlgmr.msra.gmra.mrb[24].mxu1 %vm1362_vm2, %v2032_v22 }
 0x298   :  { %2041 = vst.msk [vmem:[#allocation4 + $0x10] sm:$0xff] %vm1362_vm2, %v2033_v23  ;;  %2042 = vst.msk [vmem:[#allocation4 + $0x18] sm:$0xff] %vm1362_vm2, %v2034_v24  ;;  %4636 = vmatpush3.msra.mxu0 %v5654_v36  ;;  %4641 = vmatpush3.msra.mxu1 %v5663_v38  ;;  %v2733_v36 = vpop.permute.xlu1 %2732  ;;  %v2656_v38 = vpop.permute.xlu0 %2655 }
 0x299   :  { %2043 = vst.msk [vmem:[#allocation4 + $0x20] sm:$0xff] %vm1362_vm2, %v2035_v25  ;;  %2044 = vst.msk [vmem:[#allocation4 + $0x28] sm:$0xff] %vm1362_vm2, %v2036_v27  ;;  %4637 = vmatprep.mubr.msk.f32.mxu0 %vm5093_vm1, %v5092_v6  ;;  %4642 = vmatprep.mubr.msk.f32.mxu1 %vm5093_vm1, %v5092_v6 }
 0x29a   :  { %2045 = vst.msk [vmem:[#allocation4 + $0x30] sm:$0xff] %vm1362_vm2, %v2037_v28  ;;  %2046 = vst.msk [vmem:[#allocation4 + $0x38] sm:$0xff] %vm1362_vm2, %v2038_v29  ;;  %4645 = vmatprep.subr.mxu0 %v5092_v6  ;;  %4650 = vmatprep.subr.mxu1 %v5092_v6 }
 0x29b   :  { %4638 = vmatmul.mubr.msk.f32.vlgmr.msra.gmra.mrb[26].mxu0 %vm1362_vm2, %v2033_v23  ;;  %4643 = vmatmul.mubr.msk.f32.vlgmr.msra.gmra.mrb[26].mxu1 %vm1362_vm2, %v2034_v24 }
 0x29c   :  { %4646 = vmatpush3.msra.mxu0 %v5673_v40  ;;  %4651 = vmatpush3.msra.mxu1 %v5681_v44  ;;  %v2887_v40 = vpop.permute.xlu1 %2886 }
 0x29d   :  { %4647 = vmatprep.mubr.msk.f32.mxu0 %vm5093_vm1, %v5092_v6  ;;  %4652 = vmatprep.mubr.msk.f32.mxu1 %vm5093_vm1, %v5092_v6 }
 0x29e   :  { %4655 = vmatprep.subr.mxu0 %v5092_v6  ;;  %4660 = vmatprep.subr.mxu1 %v5092_v6 }
 0x29f   :  { %4648 = vmatmul.mubr.msk.f32.vlgmr.msra.gmra.mrb[28].mxu0 %vm1362_vm2, %v2035_v25  ;;  %4653 = vmatmul.mubr.msk.f32.vlgmr.msra.gmra.mrb[28].mxu1 %vm1362_vm2, %v2036_v27 }
 0x2a0   :  { %4656 = vmatpush3.msra.mxu0 %v5679_v43  ;;  %4661 = vmatpush3.msra.mxu1 %v5685_v46  ;;  %v2810_v43 = vpop.permute.xlu0 %2809  ;;  %v3041_v44 = vpop.permute.xlu1 %3040 }
 0x2a1   :  { %4657 = vmatprep.mubr.msk.f32.mxu0 %vm5093_vm1, %v5092_v6  ;;  %4662 = vmatprep.mubr.msk.f32.mxu1 %vm5093_vm1, %v5092_v6 }
 0x2a2   :  { %4665 = vmatprep.subr.mxu0 %v5092_v6  ;;  %4670 = vmatprep.subr.mxu1 %v5092_v6 }
 0x2a3   :  { %4658 = vmatmul.mubr.msk.f32.vlgmr.msra.gmra.mrb[30].mxu0 %vm1362_vm2, %v2037_v28  ;;  %4663 = vmatmul.mubr.msk.f32.vlgmr.msra.gmra.mrb[30].mxu1 %vm1362_vm2, %v2038_v29 }
 0x2a4   :  { %4667 = vmatprep.mubr.msk.f32.mxu0 %vm5093_vm1, %v5092_v6  ;;  %4672 = vmatprep.mubr.msk.f32.mxu1 %vm5093_vm1, %v5092_v6  ;;  %v2964_v46 = vpop.permute.xlu0 %2963 }
 0x2a7   :  { %4666 = vmatpush3.xpose.msk.msra.mxu0 %vm1362_vm2, %v2656_v38  ;;  %4671 = vmatpush3.xpose.msk.msra.mxu1 %vm1362_vm2, %v2733_v36 }
 0x2a8   :  { %4675 = vmatprep.subr.mxu0 %v5092_v6  ;;  %4680 = vmatprep.subr.mxu1 %v5092_v6 }
 0x2aa   :  { %4668 = vmatmul.mubr.msk.f32.vlgmr.msra.gmra.mrb[32].mxu0 %vm1362_vm2, %v5593_v17  ;;  %4673 = vmatmul.mubr.msk.f32.vlgmr.msra.gmra.mrb[32].mxu1 %vm1362_vm2, %v5595_v7  ;;  %v3195_v17 = vpop.permute.xlu1 %3194  ;;  %v3118_v7 = vpop.permute.xlu0 %3117 }
 0x2ab   :  { %4676 = vmatpush3.xpose.msk.msra.mxu0 %vm1362_vm2, %v2810_v43  ;;  %4681 = vmatpush3.xpose.msk.msra.mxu1 %vm1362_vm2, %v2887_v40 }
 0x2ac   :  { %4677 = vmatprep.mubr.msk.f32.mxu0 %vm5093_vm1, %v5092_v6  ;;  %4682 = vmatprep.mubr.msk.f32.mxu1 %vm5093_vm1, %v5092_v6 }
 0x2ad   :  { %4685 = vmatprep.subr.mxu0 %v5092_v6  ;;  %4690 = vmatprep.subr.mxu1 %v5092_v6 }
 0x2ae   :  { %4678 = vmatmul.mubr.msk.f32.vlgmr.msra.gmra.mrb[34].mxu0 %vm1362_vm2, %v5597_v10  ;;  %4683 = vmatmul.mubr.msk.f32.vlgmr.msra.gmra.mrb[34].mxu1 %vm1362_vm2, %v5599_v11 }
 0x2af   :  { %4686 = vmatpush3.xpose.msk.msra.mxu0 %vm1362_vm2, %v2964_v46  ;;  %4691 = vmatpush3.xpose.msk.msra.mxu1 %vm1362_vm2, %v3041_v44 }
 0x2b0   :  { %4687 = vmatprep.mubr.msk.f32.mxu0 %vm5093_vm1, %v5092_v6  ;;  %4692 = vmatprep.mubr.msk.f32.mxu1 %vm5093_vm1, %v5092_v6 }
 0x2b1   :  { %4695 = vmatprep.subr.mxu0 %v5092_v6  ;;  %4700 = vmatprep.subr.mxu1 %v5092_v6 }
 0x2b2   :  { %4688 = vmatmul.mubr.msk.f32.vlgmr.msra.gmra.mrb[36].mxu0 %vm1362_vm2, %v5601_v13  ;;  %4693 = vmatmul.mubr.msk.f32.vlgmr.msra.gmra.mrb[36].mxu1 %vm1362_vm2, %v5603_v14 }
 0x2b3   :  { %4696 = vmatpush3.xpose.msk.msra.mxu0 %vm1362_vm2, %v3118_v7  ;;  %4701 = vmatpush3.xpose.msk.msra.mxu1 %vm1362_vm2, %v3195_v17 }
 0x2b4   :  { %4697 = vmatprep.mubr.msk.f32.mxu0 %vm5093_vm1, %v5092_v6  ;;  %4702 = vmatprep.mubr.msk.f32.mxu1 %vm5093_vm1, %v5092_v6 }
 0x2b5   :  { %4705 = vmatprep.subr.mxu0 %v5092_v6  ;;  %4710 = vmatprep.subr.mxu1 %v5092_v6 }
 0x2b6   :  { %4698 = vmatmul.mubr.msk.f32.vlgmr.msra.gmra.mrb[38].mxu0 %vm1362_vm2, %v5605_v18  ;;  %4703 = vmatmul.mubr.msk.f32.vlgmr.msra.gmra.mrb[38].mxu1 %vm1362_vm2, %v5607_v19 }
 0x2b7   :  { %4706 = vmatpush3.msra.mxu0 %v5637_v26  ;;  %4711 = vmatpush3.msra.mxu1 %v5644_v30 }
 0x2b8   :  { %4707 = vmatprep.mubr.msk.f32.mxu0 %vm5093_vm1, %v5092_v6  ;;  %4712 = vmatprep.mubr.msk.f32.mxu1 %vm5093_vm1, %v5092_v6 }
 0x2b9   :  { %4715 = vmatprep.subr.mxu0 %v5092_v6  ;;  %4720 = vmatprep.subr.mxu1 %v5092_v6 }
 0x36a   :  { %v2116_v10 = vpop.f32.mrb[24].mxu0  ;;  %v2189_v11 = vpop.f32.mrb[24].mxu1 }
 0x36b   :  { %v2631_v13 = vsel %vm87_vm0, %v2116_v10, 0.0  ;;  %v2632_v14 = vsel %vm87_vm0, %v2189_v11, 0.0  ;;  %v4629_v18 = vpop.f32.mrb[25].mxu0  ;;  %v4634_v19 = vpop.f32.mrb[25].mxu1 }
 0x36c   :  { %v2633_v26 = vadd.f32 %v2632_v14, %v2631_v13 }
 0x36e   :  { %v2262_v30 = vpop.f32.mrb[26].mxu0  ;;  %v2335_v31 = vpop.f32.mrb[26].mxu1 }
 0x36f   :  { %v2634_v32 = vsel %vm87_vm0, %v2262_v30, 0.0  ;;  %v4639_v34 = vpop.f32.mrb[27].mxu0  ;;  %v4644_v48 = vpop.f32.mrb[27].mxu1  ;;  %v2636_v52 = vsel %vm87_vm0, %v2335_v31, 0.0 }
 0x370   :  { %v2635_v50 = vadd.f32 %v2634_v32, %v2633_v26 }
 0x372   :  { %v2637_v54 = vadd.f32 %v2636_v52, %v2635_v50  ;;  %v2408_v56 = vpop.f32.mrb[28].mxu0  ;;  %v2481_v47 = vpop.f32.mrb[28].mxu1 }
 0x373   :  { %v2638_v49 = vsel %vm87_vm0, %v2408_v56, 0.0  ;;  %v4649_v51 = vpop.f32.mrb[29].mxu0  ;;  %v4654_v53 = vpop.f32.mrb[29].mxu1  ;;  %v2640_v57 = vsel %vm87_vm0, %v2481_v47, 0.0 }
 0x374   :  { %v2639_v55 = vadd.f32 %v2638_v49, %v2637_v54 }
 0x376   :  { %v2641_v58 = vadd.f32 %v2640_v57, %v2639_v55  ;;  %v2554_v59 = vpop.f32.mrb[30].mxu0  ;;  %v2627_v60 = vpop.f32.mrb[30].mxu1 }
 0x377   :  { %v2642_v61 = vsel %vm87_vm0, %v2554_v59, 0.0  ;;  %v4659_v62 = vpop.f32.mrb[31].mxu0  ;;  %v4664_v63 = vpop.f32.mrb[31].mxu1  ;;  %v2644_v2 = vsel %vm87_vm0, %v2627_v60, 0.0 }
 0x378   :  { %v2643_v0 = vadd.f32 %v2642_v61, %v2641_v58 }
 0x37a   :  { %v2645_v3 = vadd.f32 %v2644_v2, %v2643_v0 }
 0x37c   :  { %v2652_v4 = vadd.f32 %v5809_v1, %v2645_v3 }
 0x37d   :  { %v2727_v5 = vpop.f32.mrb[32].mxu0  ;;  %v2804_v8 = vpop.f32.mrb[32].mxu1 }
 0x37e   :  { %2653 = vst.msk [vmem:[#allocation2] sm:$0xff] %vm87_vm0, %v2652_v4  ;;  %v4669_v9 = vpop.f32.mrb[33].mxu0  ;;  %v4674_v35 = vpop.f32.mrb[33].mxu1  ;;  %v3270_v23 = vsel %vm1362_vm2, %v2727_v5, -inf  ;;  %v3271_v24 = vsel %vm1362_vm2, %v2804_v8, -inf }
 0x381   :  { %v2881_v12 = vpop.f32.mrb[34].mxu0  ;;  %v2958_v15 = vpop.f32.mrb[34].mxu1 }
 0x382   :  { %v4679_v16 = vpop.f32.mrb[35].mxu0  ;;  %v4684_v20 = vpop.f32.mrb[35].mxu1  ;;  %v3272_v46 = vsel %vm1362_vm2, %v2881_v12, -inf  ;;  %v3273_v17 = vsel %vm1362_vm2, %v2958_v15, -inf }
 0x385   :  { %v3035_v21 = vpop.f32.mrb[36].mxu0  ;;  %v3112_v22 = vpop.f32.mrb[36].mxu1 }
 0x386   :  { %v3274_v25 = vsel %vm1362_vm2, %v3035_v21, -inf  ;;  %v3276_v27 = vsel %vm1362_vm2, %v3112_v22, -inf  ;;  %v4689_v28 = vpop.f32.mrb[37].mxu0  ;;  %v4694_v29 = vpop.f32.mrb[37].mxu1 }
 0x387   :  { %v3275_v36 = vmax.f32 %v3270_v23, %v3274_v25  ;;  %v3277_v38 = vmax.f32 %v3271_v24, %v3276_v27 }
 0x389   :  { %v3282_v40 = vmax.f32 %v3275_v36, %v3277_v38  ;;  %v3189_v43 = vpop.f32.mrb[38].mxu0  ;;  %v3266_v44 = vpop.f32.mrb[38].mxu1 }
 0x38a   :  { %v3278_v7 = vsel %vm1362_vm2, %v3189_v43, -inf  ;;  %v3280_v10 = vsel %vm1362_vm2, %v3266_v44, -inf  ;;  %v4699_v11 = vpop.f32.mrb[39].mxu0  ;;  %v4704_v13 = vpop.f32.mrb[39].mxu1 }
 0x38b   :  { %v3279_v14 = vmax.f32 %v3272_v46, %v3278_v7  ;;  %v3281_v18 = vmax.f32 %v3273_v17, %v3280_v10 }
 0x38d   :  { %v3283_v19 = vmax.f32 %v3279_v14, %v3281_v18 }
 0x38f   :  { %v3284_v26 = vmax.f32 %v3282_v40, %v3283_v19 }
 0x391   :  { %v3285_v30 = vsub.f32 %v2727_v5, %v3284_v26  ;;  %v3286_v31 = vsub.f32 %v2804_v8, %v3284_v26  ;;  %v3287_v32 = vsub.f32 %v2881_v12, %v3284_v26  ;;  %v3288_v34 = vsub.f32 %v2958_v15, %v3284_v26 }
 0x392   :  { %v3289_v48 = vsub.f32 %v3035_v21, %v3284_v26  ;;  %v3290_v50 = vsub.f32 %v3112_v22, %v3284_v26  ;;  %v3291_v52 = vsub.f32 %v3189_v43, %v3284_v26  ;;  %v3292_v54 = vsub.f32 %v3266_v44, %v3284_v26 }
 0x393   :  { %v3293_v56 = vmul.f32 1.442695, %v3285_v30  ;;  %v3295_v47 = vmul.f32 1.442695, %v3286_v31  ;;  %v3297_v49 = vmul.f32 1.442695, %v3287_v32 }
 0x394   :  { %v3299_v51 = vmul.f32 1.442695, %v3288_v34  ;;  %v3301_v53 = vmul.f32 1.442695, %v3289_v48  ;;  %v3303_v55 = vmul.f32 1.442695, %v3290_v50 }
 0x395   :  { %5026 = vpow2.f32 %v3293_v56  ;;  %v3305_v57 = vmul.f32 1.442695, %v3291_v52  ;;  %v3307_v58 = vmul.f32 1.442695, %v3292_v54 }
 0x396   :  { %5028 = vpow2.f32 %v3295_v47 }
 0x397   :  { %5030 = vpow2.f32 %v3297_v49 }
 0x398   :  { %5032 = vpow2.f32 %v3299_v51 }
 0x399   :  { %5034 = vpow2.f32 %v3301_v53 }
 0x39a   :  { %5036 = vpow2.f32 %v3303_v55 }
 0x39b   :  { %5038 = vpow2.f32 %v3305_v57 }
 0x39c   :  { %5040 = vpow2.f32 %v3307_v58 }
 0x39f   :  { %v5027_v59 = vpop.eup %5026 }
 0x3a0   :  { %v5029_v60 = vpop.eup %5028  ;;  %v3309_v61 = vsel %vm1362_vm2, %v5027_v59, 0.0 }
 0x3a1   :  { %v5031_v62 = vpop.eup %5030  ;;  %v3310_v63 = vsel %vm1362_vm2, %v5029_v60, 0.0 }
 0x3a2   :  { %v5033_v0 = vpop.eup %5032  ;;  %v3311_v2 = vadd.f32 %v3310_v63, %v3309_v61  ;;  %v3312_v3 = vsel %vm1362_vm2, %v5031_v62, 0.0 }
 0x3a3   :  { %v5035_v4 = vpop.eup %5034  ;;  %v3314_v8 = vsel %vm1362_vm2, %v5033_v0, 0.0 }
 0x3a4   :  { %v3313_v5 = vadd.f32 %v3312_v3, %v3311_v2  ;;  %v5037_v9 = vpop.eup %5036  ;;  %v3316_v12 = vsel %vm1362_vm2, %v5035_v4, 0.0 }
 0x3a5   :  { %v5039_v15 = vpop.eup %5038  ;;  %v3318_v20 = vsel %vm1362_vm2, %v5037_v9, 0.0 }
 0x3a6   :  { %v3315_v35 = vadd.f32 %v3314_v8, %v3313_v5  ;;  %v5041_v21 = vpop.eup %5040  ;;  %v3320_v23 = vsel %vm1362_vm2, %v5039_v15, 0.0 }
 0x3a7   :  { %v3322_v25 = vsel %vm1362_vm2, %v5041_v21, 0.0 }
 0x3a8   :  { %v3317_v16 = vadd.f32 %v3316_v12, %v3315_v35 }
 0x3aa   :  { %v3319_v22 = vadd.f32 %v3318_v20, %v3317_v16 }
 0x3ac   :  { %v3321_v24 = vadd.f32 %v3320_v23, %v3319_v22 }
 0x3ae   :  { %v3323_v27 = vadd.f32 %v3322_v25, %v3321_v24 }
 0x3b0   :  { %5042 = vrcp.f32 %v3323_v27 }
 0x3ba   :  { %v5043_v28 = vpop.eup %5042 }
 0x3bb   :  { %v3325_v29 = vmul.f32 %v5043_v28, %v5027_v59  ;;  %v3326_v36 = vmul.f32 %v5043_v28, %v5029_v60  ;;  %v3327_v38 = vmul.f32 %v5043_v28, %v5031_v62  ;;  %v3328_v40 = vmul.f32 %v5043_v28, %v5033_v0 }
 0x3bc   :  { %v3329_v43 = vmul.f32 %v5043_v28, %v5035_v4  ;;  %v3330_v44 = vmul.f32 %v5043_v28, %v5037_v9  ;;  %v3331_v46 = vmul.f32 %v5043_v28, %v5039_v15  ;;  %v3332_v17 = vmul.f32 %v5043_v28, %v5041_v21 }
 0x3bd   :  { %3334 = vst.msk [vmem:[#allocation4 + $0x40] sm:$0xff] %vm1362_vm2, %v3325_v29  ;;  %4708 = vmatmul.mubr.msk.f32.vlgmr.msra.gmra.mrb[40].mxu0 %vm1362_vm2, %v3325_v29  ;;  %3335 = vst.msk [vmem:[#allocation4 + $0x48] sm:$0xff] %vm1362_vm2, %v3326_v36  ;;  %4713 = vmatmul.mubr.msk.f32.vlgmr.msra.gmra.mrb[40].mxu1 %vm1362_vm2, %v3326_v36 }
 0x3be   :  { %3336 = vst.msk [vmem:[#allocation4 + $0x50] sm:$0xff] %vm1362_vm2, %v3327_v38  ;;  %3337 = vst.msk [vmem:[#allocation4 + $0x58] sm:$0xff] %vm1362_vm2, %v3328_v40  ;;  %4716 = vmatpush3.msra.mxu0 %v5651_v33  ;;  %4721 = vmatpush3.msra.mxu1 %v5660_v37 }
 0x3bf   :  { %3338 = vst.msk [vmem:[#allocation4 + $0x60] sm:$0xff] %vm1362_vm2, %v3329_v43  ;;  %3339 = vst.msk [vmem:[#allocation4 + $0x68] sm:$0xff] %vm1362_vm2, %v3330_v44  ;;  %4717 = vmatprep.mubr.msk.f32.mxu0 %vm5093_vm1, %v5092_v6  ;;  %4722 = vmatprep.mubr.msk.f32.mxu1 %vm5093_vm1, %v5092_v6 }
 0x3c0   :  { %3340 = vst.msk [vmem:[#allocation4 + $0x70] sm:$0xff] %vm1362_vm2, %v3331_v46  ;;  %3341 = vst.msk [vmem:[#allocation4 + $0x78] sm:$0xff] %vm1362_vm2, %v3332_v17  ;;  %4725 = vmatprep.subr.mxu0 %v5092_v6  ;;  %4730 = vmatprep.subr.mxu1 %v5092_v6 }
 0x3c1   :  { %4718 = vmatmul.mubr.msk.f32.vlgmr.msra.gmra.mrb[42].mxu0 %vm1362_vm2, %v3327_v38  ;;  %4723 = vmatmul.mubr.msk.f32.vlgmr.msra.gmra.mrb[42].mxu1 %vm1362_vm2, %v3328_v40 }
 0x3c2   :  { %4726 = vmatpush3.msra.mxu0 %v5671_v39  ;;  %4731 = vmatpush3.msra.mxu1 %v5675_v41 }
 0x3c3   :  { %4727 = vmatprep.mubr.msk.f32.mxu0 %vm5093_vm1, %v5092_v6  ;;  %4732 = vmatprep.mubr.msk.f32.mxu1 %vm5093_vm1, %v5092_v6 }
 0x3c4   :  { %4735 = vmatprep.subr.mxu0 %v5092_v6  ;;  %4740 = vmatprep.subr.mxu1 %v5092_v6 }
 0x3c5   :  { %4728 = vmatmul.mubr.msk.f32.vlgmr.msra.gmra.mrb[44].mxu0 %vm1362_vm2, %v3329_v43  ;;  %4733 = vmatmul.mubr.msk.f32.vlgmr.msra.gmra.mrb[44].mxu1 %vm1362_vm2, %v3330_v44 }
 0x3c6   :  { %4736 = vmatpush3.msra.mxu0 %v5677_v42  ;;  %4741 = vmatpush3.msra.mxu1 %v5683_v45 }
 0x3c7   :  { %4737 = vmatprep.mubr.msk.f32.mxu0 %vm5093_vm1, %v5092_v6  ;;  %4742 = vmatprep.mubr.msk.f32.mxu1 %vm5093_vm1, %v5092_v6 }
 0x3c9   :  { %4738 = vmatmul.mubr.msk.f32.vlgmr.msra.gmra.mrb[46].mxu0 %vm1362_vm2, %v3331_v46  ;;  %4743 = vmatmul.mubr.msk.f32.vlgmr.msra.gmra.mrb[46].mxu1 %vm1362_vm2, %v3332_v17 }
 0x3ca   :  { %5055 = shalt.err (!%p5052_p4)
}
 0x3cb   :  { %s5056_s21 = scalar_lea.hbm %s5913_s5, 2048 }
 0x3cc   :  { %p5057_p5 = scmp.ne.s32.totalorder %s5913_s5, %s5056_s21  ;;  %p5060_p6 = scmp.lt.u32.totalorder %s5056_s21, %s5913_s5 }
 0x3ce   :  { %p5062_p7 = pnand %p5060_p6, %p5057_p5 }
 0x3d0   :  { %5065 = shalt.err (!%p5062_p7)
}
 0x3d1   :  { %s5096_s25 = smov 128   ;;  %s5097_s0 = smov 8  }
 0x3d2   :  { %3967 = dma.vmem_to_hbm [thread:$0]  %s3962_s17, 2048, %s5913_s5, [#allocation5], %s5096_s25, %s5096_s25, %s5097_s0  }
 0x3d3   :  { %s5098_s5 = smov [#allocation2]  }
 0x3d4   :  { %s3949_s28 = sshll.u32 %s5098_s5, 4  ;;  %s3950_s28 = int_to_ptr.vmem [resolvable:$true] %s3949_s28 }
 0x3d5   :  { %s5066_s29 = scalar_lea.vmem %s3950_s28, 256  ;;  %p5071_p9 = scmp.lt.s32.totalorder %s3950_s28, %s3950_s28 }
 0x3d6   :  { %p5067_p8 = scmp.ne.s32.totalorder %s3950_s28, %s5066_s29  ;;  %p5072_p10 = scmp.lt.s32.totalorder %s5066_s29, %s5066_s29 }
 0x3d8   :  { %p5073_p11 = por %p5072_p10, %p5071_p9 }
 0x3da   :  { %p5074_p12 = pnand %p5073_p11, %p5067_p8 }
 0x490   :  { %v3411_v6 = vpop.f32.mrb[40].mxu0  ;;  %v3484_v33 = vpop.f32.mrb[40].mxu1 }
 0x491   :  { %v3926_v37 = vsel %vm87_vm0, %v3411_v6, 0.0  ;;  %v3927_v39 = vsel %vm87_vm0, %v3484_v33, 0.0  ;;  %v4709_v41 = vpop.f32.mrb[41].mxu0  ;;  %v4714_v42 = vpop.f32.mrb[41].mxu1 }
 0x492   :  { %v3928_v45 = vadd.f32 %v3927_v39, %v3926_v37 }
 0x494   :  { %v3557_v7 = vpop.f32.mrb[42].mxu0  ;;  %v3630_v10 = vpop.f32.mrb[42].mxu1 }
 0x495   :  { %v3929_v11 = vsel %vm87_vm0, %v3557_v7, 0.0  ;;  %v4719_v13 = vpop.f32.mrb[43].mxu0  ;;  %v4724_v14 = vpop.f32.mrb[43].mxu1  ;;  %v3931_v19 = vsel %vm87_vm0, %v3630_v10, 0.0 }
 0x496   :  { %v3930_v18 = vadd.f32 %v3929_v11, %v3928_v45 }
 0x498   :  { %v3932_v26 = vadd.f32 %v3931_v19, %v3930_v18  ;;  %v3703_v30 = vpop.f32.mrb[44].mxu0  ;;  %v3776_v31 = vpop.f32.mrb[44].mxu1 }
 0x499   :  { %v3933_v32 = vsel %vm87_vm0, %v3703_v30, 0.0  ;;  %v4729_v34 = vpop.f32.mrb[45].mxu0  ;;  %v4734_v48 = vpop.f32.mrb[45].mxu1  ;;  %v3935_v52 = vsel %vm87_vm0, %v3776_v31, 0.0 }
 0x49a   :  { %v3934_v50 = vadd.f32 %v3933_v32, %v3932_v26 }
 0x49c   :  { %v3936_v54 = vadd.f32 %v3935_v52, %v3934_v50  ;;  %v3849_v56 = vpop.f32.mrb[46].mxu0  ;;  %v3922_v47 = vpop.f32.mrb[46].mxu1 }
 0x49d   :  { %v3937_v49 = vsel %vm87_vm0, %v3849_v56, 0.0  ;;  %v4739_v51 = vpop.f32.mrb[47].mxu0  ;;  %v4744_v53 = vpop.f32.mrb[47].mxu1  ;;  %v3939_v57 = vsel %vm87_vm0, %v3922_v47, 0.0 }
 0x49e   :  { %v3938_v55 = vadd.f32 %v3937_v49, %v3936_v54 }
 0x4a0   :  { %v3940_v58 = vadd.f32 %v3939_v57, %v3938_v55 }
 0x4a2   :  { %v3941_v59 = vadd.f32 %v5809_v1, %v3940_v58 }
 0x4a4   :  { %3943 = vst.msk [vmem:[#allocation2 + $0x8] sm:$0xff] %vm87_vm0, %v3941_v59 }
 0x4a5   :  { %5077 = shalt.err (!%p5074_p12)
}
 0x4a6   :  { %s5078_s7 = scalar_lea.hbm %s5912_s4, 256 }
 0x4a7   :  { %p5079_p13 = scmp.ne.s32.totalorder %s5912_s4, %s5078_s7  ;;  %p5082_p0 = scmp.lt.u32.totalorder %s5078_s7, %s5912_s4 }
 0x4a9   :  { %p5084_p1 = pnand %p5082_p0, %p5079_p13 }
 0x4ab   :  { %5087 = shalt.err (!%p5084_p1)
}
 0x4ac   :  { %3955 = dma.vmem_to_hbm [thread:$0]  %s3950_s28, 256, %s5912_s4, [#allocation3], %s5096_s25, %s5096_s25, %s5097_s0  }
 0x4ad   :  { %5088 = dma.done.wait [#allocation3], 256  }
 0x4ae   :  { %5089 = vsyncadd [#allocation3], 4294967040 }
 0x4af   :  { %5090 = dma.done.wait [#allocation5], 2048  }
 0x4b0   :  { %5091 = vsyncadd [#allocation5], 4294965248 }
 0x4b1   :  { %3974 = vsyncpa [#allocation3], 1 }
 0x4b2   :  { %3975 = vsyncpa [#allocation5], 1 }

</bundles_post_ra>
